<compile_context>
chip_gen: v6e
topology: v6e:2x2x1
jax: 0.10.0
libtpu: 0.0.40
codegen_flags: <defaults>
</compile_context>

<pallas_src>
import jax
import jax.numpy as jnp
from jax.experimental import pallas as pl
from jax.experimental.pallas import tpu as pltpu


def _round_up(x, m):
    return ((x + m - 1) // m) * m


def _visc_penn_wlf_kernel(fp_t_ref, aux_ref,
                          w1f_ref, w1p_ref, b1_ref,
                          w2_ref, b2_ref, w3_ref, b3_ref,
                          scale_ref, shift_ref, sigm_ref,
                          eta_ref):
    f32 = jnp.float32
    fp_t = fp_t_ref[...]              # (n_fp, bt)   features x batch (lanes)
    aux = aux_ref[...]                # (8, bt)      rows: PDI, M, S, T, 0...
    pdi = aux[0:1, :]                 # (1, bt)
    M = aux[1:2, :]
    S = aux[2:3, :]
    T = aux[3:4, :]

    # layer_1 -> d1(identity) -> ReLU.  Split-K: W1f^T @ fp^T + W1p^T * PDI + b1.
    h1 = jnp.dot(w1f_ref[...], fp_t, preferred_element_type=f32)     # (l1p, bt)
    h1 = h1 + w1p_ref[...] * pdi + b1_ref[...]
    h1 = jnp.maximum(h1, 0.0)

    # layer_2 -> d2(identity) -> ReLU.
    h2 = jnp.dot(w2_ref[...], h1, preferred_element_type=f32) + b2_ref[...]
    h2 = jnp.maximum(h2, 0.0)                                        # (l2p, bt)

    # out layer -> latent params p, padded to 16 sublane rows (rows >= 11 are 0).
    p = jnp.dot(w3_ref[...], h2, preferred_element_type=f32) + b3_ref[...]  # (16, bt)

    # Per-row squash: sigmoid or tanh (selected by sigm mask in {0,1}), then affine.
    sig = 1.0 / (1.0 + jnp.exp(-p))
    tnh = jnp.tanh(p)
    sigm = sigm_ref[...]                                             # (16, 1)
    tp = (sigm * sig + (1.0 - sigm) * tnh) * scale_ref[...] + shift_ref[...]

    # Latent parameters: cheap static sublane row-slices, each (1, bt), lane-dense.
    alpha_1 = tp[0:1, :]          # sigmoid * 3
    alpha_2 = tp[1:2, :]          # sigmoid * 6
    k_1 = tp[2:3, :]              # 2 * tanh - 1
    beta_M = tp[3:4, :]           # 20 + sigmoid * 40
    M_cr = tp[4:5, :]             # tanh
    C_1 = tp[5:6, :]              # sigmoid * 2
    C_2 = tp[6:7, :]              # sigmoid * 2
    T_r = tp[7:8, :]              # tanh - 1
    n_s = tp[8:9, :]              # sigmoid
    crit_sh = tp[9:10, :]         # tanh
    beta_sh = tp[10:11, :]        # sigmoid * 30

    # WLF temperature shift: a_t = -C1 * (T - T_r) / (C2 + (T - T_r))
    t_shift = T - T_r
    a_t = -(C_1 * t_shift) / (C_2 + t_shift)

    # MolWeight layer (HeavySide(beta, x) == sigmoid(beta * x)), k_1 := k_1 + a_t
    k1_eff = k_1 + a_t
    low_mw = k1_eff + alpha_1 * M
    k_2 = k1_eff + (alpha_1 - alpha_2) * M_cr
    high_mw = k_2 + alpha_2 * M
    hw = 1.0 / (1.0 + jnp.exp(-beta_M * (M - M_cr)))
    lw = 1.0 / (1.0 + jnp.exp(-beta_M * (M_cr - M)))
    eta_0 = low_mw * lw + high_mw * hw

    # ShearRate_softplus layer
    s_sc = beta_sh * (S - crit_sh)
    eta = eta_0 - (1.0 / beta_sh) * n_s * (jnp.log(1.0 + jnp.exp(-s_sc)) + s_sc)

    eta_ref[...] = eta.astype(eta_ref.dtype)     # (1, bt), lane-dense store


def visc_penn_wlf_forward(fp, M, S, T, PDI, params, *, batch_tile=512):
    """JAX wrapper mirroring Visc_PENN_WLF_Hybrid.forward (eval path, returns eta [B,1])."""
    f32 = jnp.float32
    fp = fp.astype(f32)
    B, n_fp = fp.shape

    w1, b1, w2, b2, w3, b3 = (params[k] for k in ("w1", "b1", "w2", "b2", "w3", "b3"))
    assert w1.shape[0] == n_fp + 1
    l1, l2, n_out = w1.shape[1], w2.shape[1], w3.shape[1]
    l1p = _round_up(l1, 128)
    l2p = _round_up(l2, 128)
    n_out_p = _round_up(max(n_out, 11), 8)       # latent head only needs 16 rows

    # Transposed (feature, batch) activations.
    fp_t = fp.T                                   # (n_fp, B)
    aux = jnp.zeros((8, B), f32)
    aux = aux.at[0].set(PDI.reshape(B).astype(f32))
    aux = aux.at[1].set(M.reshape(B).astype(f32))
    aux = aux.at[2].set(S.reshape(B).astype(f32))
    aux = aux.at[3].set(T.reshape(B).astype(f32))

    # Transposed weights, zero-padded so every GEMM operand is (8,128)-aligned.
    # ReLU(0)=0 and zero pad rows/cols keep results exact.
    w1fT = jnp.pad(w1[:n_fp, :].astype(f32).T, ((0, l1p - l1), (0, 0)))       # (l1p, n_fp)
    w1pT = jnp.pad(w1[n_fp, :].astype(f32).reshape(l1, 1), ((0, l1p - l1), (0, 0)))
    b1T = jnp.pad(b1.astype(f32).reshape(l1, 1), ((0, l1p - l1), (0, 0)))
    w2T = jnp.pad(w2.astype(f32).T, ((0, l2p - l2), (0, l1p - l1)))           # (l2p, l1p)
    b2T = jnp.pad(b2.astype(f32).reshape(l2, 1), ((0, l2p - l2), (0, 0)))
    w3T = jnp.pad(w3.astype(f32).T, ((0, n_out_p - n_out), (0, l2p - l2)))    # (n_out_p, l2p)
    b3T = jnp.pad(b3.astype(f32).reshape(n_out, 1), ((0, n_out_p - n_out), (0, 0)))

    # Latent-row squash constants: out_j = scale_j * act_j(p_j) + shift_j,
    # act_j = sigmoid where sigm_j == 1 else tanh.
    scale = jnp.zeros((n_out_p, 1), f32).at[:11, 0].set(
        jnp.array([3., 6., 2., 40., 1., 2., 2., 1., 1., 1., 30.], f32))
    shift = jnp.zeros((n_out_p, 1), f32).at[:11, 0].set(
        jnp.array([0., 0., -1., 20., 0., 0., 0., -1., 0., 0., 0.], f32))
    sigm = jnp.zeros((n_out_p, 1), f32).at[:11, 0].set(
        jnp.array([1., 1., 0., 1., 0., 1., 1., 0., 1., 0., 1.], f32))

    # Batch tile: multiple of 128 (batch sits in the lane dim), large enough to
    # amortize per-step overhead, but >= 2 grid steps when possible for megacore.
    bt = min(batch_tile, _round_up(B, 128))
    if B >= 256:
        bt = min(bt, _round_up(pl.cdiv(B, 2), 128))
    bt = max(128, _round_up(bt, 128))
    grid = (pl.cdiv(B, bt),)

    flops = 2 * B * (n_fp * l1p + l1p * l2p + l2p * n_out_p) + 60 * B
    transcendentals = B * (2 * n_out_p + 5)
    bytes_accessed = 4 * (B * (n_fp + 8 + 1)
                          + l1p * n_fp + 3 * l1p + l1p * l2p + l2p
                          + n_out_p * l2p + 4 * n_out_p)

    row = lambda i: (0, i)
    fixed = lambda i: (0, 0)

    eta_row = pl.pallas_call(
        _visc_penn_wlf_kernel,
        out_shape=jax.ShapeDtypeStruct((1, B), f32),
        grid_spec=pltpu.PrefetchScalarGridSpec(
            num_scalar_prefetch=0,
            grid=grid,
            in_specs=[
                pl.BlockSpec((n_fp, bt), row),        # fp^T        (tiled over batch lanes)
                pl.BlockSpec((8, bt), row),           # PDI/M/S/T rows
                pl.BlockSpec((l1p, n_fp), fixed),     # W1^T (fp part)   resident
                pl.BlockSpec((l1p, 1), fixed),        # W1^T (PDI col)
                pl.BlockSpec((l1p, 1), fixed),        # b1
                pl.BlockSpec((l2p, l1p), fixed),      # W2^T
                pl.BlockSpec((l2p, 1), fixed),        # b2
                pl.BlockSpec((n_out_p, l2p), fixed),  # W3^T
                pl.BlockSpec((n_out_p, 1), fixed),    # b3
                pl.BlockSpec((n_out_p, 1), fixed),    # scale
                pl.BlockSpec((n_out_p, 1), fixed),    # shift
                pl.BlockSpec((n_out_p, 1), fixed),    # sigmoid/tanh mask
            ],
            out_specs=pl.BlockSpec((1, bt), row),     # lane-dense output
        ),
        compiler_params=pltpu.CompilerParams(
            dimension_semantics=("parallel",)),
        cost_estimate=pl.CostEstimate(
            flops=flops, transcendentals=transcendentals,
            bytes_accessed=bytes_accessed),
    )(fp_t, aux, w1fT, w1pT, b1T, w2T, b2T, w3T, b3T, scale, shift, sigm)

    return eta_row.reshape(B, 1)


def init_params(key, n_fp, l1=120, l2=120, latent_param_size=11):
    """nn.Linear-style init; weights stored transposed as (in_features, out_features)."""
    ks = jax.random.split(key, 6)
    n_in = n_fp + 1

    def linear(kw, kb, fan_in, fan_out):
        bound = 1.0 / jnp.sqrt(fan_in)
        w = jax.random.uniform(kw, (fan_in, fan_out), jnp.float32, -bound, bound)
        b = jax.random.uniform(kb, (fan_out,), jnp.float32, -bound, bound)
        return w, b

    w1, b1 = linear(ks[0], ks[1], n_in, l1)
    w2, b2 = linear(ks[2], ks[3], l1, l2)
    w3, b3 = linear(ks[4], ks[5], l2, latent_param_size)
    return dict(w1=w1, b1=b1, w2=w2, b2=b2, w3=w3, b3=b3)


def reference_forward(fp, M, S, T, PDI, params):
    """Pure-JAX reference of Visc_PENN_WLF_Hybrid.forward (eval path)."""
    sig = lambda v: 1.0 / (1.0 + jnp.exp(-v))
    x = jnp.concatenate((fp, PDI.reshape(-1, 1)), axis=1)
    h = jnp.maximum(x @ params["w1"] + params["b1"], 0.0)
    h = jnp.maximum(h @ params["w2"] + params["b2"], 0.0)
    p = h @ params["w3"] + params["b3"]

    M = M.reshape(-1); S = S.reshape(-1); T = T.reshape(-1)
    alpha_1 = sig(p[:, 0]) * 3.0
    alpha_2 = sig(p[:, 1]) * 6.0
    k_1 = 2.0 * jnp.tanh(p[:, 2]) - 1.0
    beta_M = 20.0 + sig(p[:, 3]) * 40.0
    M_cr = jnp.tanh(p[:, 4])
    C_1 = sig(p[:, 5]) * 2.0
    C_2 = sig(p[:, 6]) * 2.0
    T_r = jnp.tanh(p[:, 7]) - 1.0
    n_s = sig(p[:, 8])
    crit_sh = jnp.tanh(p[:, 9])
    beta_sh = sig(p[:, 10]) * 30.0

    t_shift = T - T_r
    a_t = -(C_1 * t_shift) / (C_2 + t_shift)
    k1_eff = k_1 + a_t
    low_mw = k1_eff + alpha_1 * M
    k_2 = k1_eff + (alpha_1 - alpha_2) * M_cr
    high_mw = k_2 + alpha_2 * M
    hw = sig(beta_M * (M - M_cr))
    lw = sig(beta_M * (M_cr - M))
    eta_0 = low_mw * lw + high_mw * hw

    s_sc = beta_sh * (S - crit_sh)
    eta = eta_0 - (1.0 / beta_sh) * n_s * (jnp.log(1.0 + jnp.exp(-s_sc)) + s_sc)
    return eta[:, None]


if __name__ == "__main__":
    key = jax.random.PRNGKey(0)
    k_fp, k_pdi, k_m, k_s, k_t, k_par = jax.random.split(key, 6)

    n_fp = 16
    batch = 300   # not a multiple of the tile -> exercises the partial edge block

    fp = jax.random.normal(k_fp, (batch, n_fp), jnp.float32)
    PDI = jax.random.normal(k_pdi, (batch, 1), jnp.float32)
    M = jax.random.uniform(k_m, (batch,), jnp.float32, -1.0, 1.0)
    S = jax.random.uniform(k_s, (batch,), jnp.float32, -1.0, 1.0)
    T = jax.random.uniform(k_t, (batch,), jnp.float32, 0.25, 1.25)

    params = init_params(k_par, n_fp)

    eta = jax.block_until_ready(visc_penn_wlf_forward(fp, M, S, T, PDI, params))
    ref = reference_forward(fp, M, S, T, PDI, params)

    assert eta.shape == (batch, 1), eta.shape
    max_err = float(jnp.max(jnp.abs(eta - ref)))
    assert jnp.allclose(eta, ref, atol=2e-3, rtol=2e-3), max_err
    print("KERNEL_OK")
</pallas_src>

<mosaic_0001>
module attributes {stable_mosaic.version = 11 : i64} {
  func.func @_visc_penn_wlf_kernel(%arg0: i32, %arg1: memref<16x256xf32, #tpu.memory_space<vmem>>, %arg2: memref<8x256xf32, #tpu.memory_space<vmem>>, %arg3: memref<128x16xf32, #tpu.memory_space<vmem>>, %arg4: memref<128x1xf32, #tpu.memory_space<vmem>>, %arg5: memref<128x1xf32, #tpu.memory_space<vmem>>, %arg6: memref<128x128xf32, #tpu.memory_space<vmem>>, %arg7: memref<128x1xf32, #tpu.memory_space<vmem>>, %arg8: memref<16x128xf32, #tpu.memory_space<vmem>>, %arg9: memref<16x1xf32, #tpu.memory_space<vmem>>, %arg10: memref<16x1xf32, #tpu.memory_space<vmem>>, %arg11: memref<16x1xf32, #tpu.memory_space<vmem>>, %arg12: memref<16x1xf32, #tpu.memory_space<vmem>>, %arg13: memref<1x256xf32, #tpu.memory_space<vmem>>) attributes {dimension_semantics = [#tpu.dimension_semantics<parallel>], iteration_bounds = array<i64: 2>, scalar_prefetch = 0 : i64, scratch_operands = 0 : i64, tpu.core_type = #tpu.core_type<tc>, window_params = [{transform_indices = @transform_0, window_bounds = array<i64: 16, 256>}, {transform_indices = @transform_1, window_bounds = array<i64: 8, 256>}, {pipeline_mode = #tpu.pipeline_mode<synchronous>, transform_indices = @transform_2, window_bounds = array<i64: 128, 16>}, {pipeline_mode = #tpu.pipeline_mode<synchronous>, transform_indices = @transform_3, window_bounds = array<i64: 128, 1>}, {pipeline_mode = #tpu.pipeline_mode<synchronous>, transform_indices = @transform_4, window_bounds = array<i64: 128, 1>}, {pipeline_mode = #tpu.pipeline_mode<synchronous>, transform_indices = @transform_5, window_bounds = array<i64: 128, 128>}, {pipeline_mode = #tpu.pipeline_mode<synchronous>, transform_indices = @transform_6, window_bounds = array<i64: 128, 1>}, {pipeline_mode = #tpu.pipeline_mode<synchronous>, transform_indices = @transform_7, window_bounds = array<i64: 16, 128>}, {pipeline_mode = #tpu.pipeline_mode<synchronous>, transform_indices = @transform_8, window_bounds = array<i64: 16, 1>}, {pipeline_mode = #tpu.pipeline_mode<synchronous>, transform_indices = @transform_9, window_bounds = array<i64: 16, 1>}, {pipeline_mode = #tpu.pipeline_mode<synchronous>, transform_indices = @transform_10, window_bounds = array<i64: 16, 1>}, {pipeline_mode = #tpu.pipeline_mode<synchronous>, transform_indices = @transform_11, window_bounds = array<i64: 16, 1>}, {transform_indices = @transform_12, window_bounds = array<i64: 1, 256>}]} {
    %c0 = arith.constant 0 : index
    %c0_0 = arith.constant 0 : index
    %0 = vector.load %arg1[%c0, %c0_0] : memref<16x256xf32, #tpu.memory_space<vmem>>, vector<16x256xf32>
    %c0_1 = arith.constant 0 : index
    %c0_2 = arith.constant 0 : index
    %1 = vector.load %arg2[%c0_1, %c0_2] : memref<8x256xf32, #tpu.memory_space<vmem>>, vector<8x256xf32>
    %2 = vector.extract_strided_slice %1 {offsets = [0, 0], sizes = [1, 256], strides = [1, 1]} : vector<8x256xf32> to vector<1x256xf32>
    %3 = vector.extract_strided_slice %1 {offsets = [1, 0], sizes = [1, 256], strides = [1, 1]} : vector<8x256xf32> to vector<1x256xf32>
    %4 = vector.extract_strided_slice %1 {offsets = [2, 0], sizes = [1, 256], strides = [1, 1]} : vector<8x256xf32> to vector<1x256xf32>
    %5 = vector.extract_strided_slice %1 {offsets = [3, 0], sizes = [1, 256], strides = [1, 1]} : vector<8x256xf32> to vector<1x256xf32>
    %c0_3 = arith.constant 0 : index
    %c0_4 = arith.constant 0 : index
    %6 = vector.load %arg3[%c0_3, %c0_4] : memref<128x16xf32, #tpu.memory_space<vmem>>, vector<128x16xf32>
    %cst = arith.constant dense<0.000000e+00> : vector<128x256xf32>
    %7 = tpu.matmul %6, %0, %cst {dimension_numbers = #tpu.dot_dimension_numbers<[1], [0], [0], [1], [0, 0, 1, 1], [], []>} : vector<128x16xf32>, vector<16x256xf32>, vector<128x256xf32> -> vector<128x256xf32>
    %c0_5 = arith.constant 0 : index
    %c0_6 = arith.constant 0 : index
    %8 = vector.load %arg4[%c0_5, %c0_6] : memref<128x1xf32, #tpu.memory_space<vmem>>, vector<128x1xf32>
    %9 = vector.broadcast %8 : vector<128x1xf32> to vector<128x256xf32>
    %10 = vector.broadcast %2 : vector<1x256xf32> to vector<128x256xf32>
    %11 = arith.mulf %9, %10 : vector<128x256xf32>
    %12 = arith.addf %7, %11 : vector<128x256xf32>
    %c0_7 = arith.constant 0 : index
    %c0_8 = arith.constant 0 : index
    %13 = vector.load %arg5[%c0_7, %c0_8] : memref<128x1xf32, #tpu.memory_space<vmem>>, vector<128x1xf32>
    %14 = vector.broadcast %13 : vector<128x1xf32> to vector<128x256xf32>
    %15 = arith.addf %12, %14 : vector<128x256xf32>
    %cst_9 = arith.constant 0.000000e+00 : f32
    %16 = vector.broadcast %cst_9 : f32 to vector<128x256xf32>
    %17 = arith.maximumf %15, %16 : vector<128x256xf32>
    %c0_10 = arith.constant 0 : index
    %c0_11 = arith.constant 0 : index
    %18 = vector.load %arg6[%c0_10, %c0_11] : memref<128x128xf32, #tpu.memory_space<vmem>>, vector<128x128xf32>
    %cst_12 = arith.constant dense<0.000000e+00> : vector<128x256xf32>
    %19 = tpu.matmul %18, %17, %cst_12 {dimension_numbers = #tpu.dot_dimension_numbers<[1], [0], [0], [1], [0, 0, 1, 1], [], []>} : vector<128x128xf32>, vector<128x256xf32>, vector<128x256xf32> -> vector<128x256xf32>
    %c0_13 = arith.constant 0 : index
    %c0_14 = arith.constant 0 : index
    %20 = vector.load %arg7[%c0_13, %c0_14] : memref<128x1xf32, #tpu.memory_space<vmem>>, vector<128x1xf32>
    %21 = vector.broadcast %20 : vector<128x1xf32> to vector<128x256xf32>
    %22 = arith.addf %19, %21 : vector<128x256xf32>
    %cst_15 = arith.constant 0.000000e+00 : f32
    %23 = vector.broadcast %cst_15 : f32 to vector<128x256xf32>
    %24 = arith.maximumf %22, %23 : vector<128x256xf32>
    %c0_16 = arith.constant 0 : index
    %c0_17 = arith.constant 0 : index
    %25 = vector.load %arg8[%c0_16, %c0_17] : memref<16x128xf32, #tpu.memory_space<vmem>>, vector<16x128xf32>
    %cst_18 = arith.constant dense<0.000000e+00> : vector<16x256xf32>
    %26 = tpu.matmul %25, %24, %cst_18 {dimension_numbers = #tpu.dot_dimension_numbers<[1], [0], [0], [1], [0, 0, 1, 1], [], []>} : vector<16x128xf32>, vector<128x256xf32>, vector<16x256xf32> -> vector<16x256xf32>
    %c0_19 = arith.constant 0 : index
    %c0_20 = arith.constant 0 : index
    %27 = vector.load %arg9[%c0_19, %c0_20] : memref<16x1xf32, #tpu.memory_space<vmem>>, vector<16x1xf32>
    %28 = vector.broadcast %27 : vector<16x1xf32> to vector<16x256xf32>
    %29 = arith.addf %26, %28 : vector<16x256xf32>
    %cst_21 = arith.constant 0.000000e+00 : f32
    %30 = vector.broadcast %cst_21 : f32 to vector<16x256xf32>
    %31 = arith.subf %30, %29 : vector<16x256xf32>
    %32 = math.exp %31 : vector<16x256xf32>
    %cst_22 = arith.constant 1.000000e+00 : f32
    %33 = vector.broadcast %cst_22 : f32 to vector<16x256xf32>
    %34 = arith.addf %33, %32 : vector<16x256xf32>
    %cst_23 = arith.constant 1.000000e+00 : f32
    %35 = vector.broadcast %cst_23 : f32 to vector<16x256xf32>
    %36 = arith.divf %35, %34 : vector<16x256xf32>
    %37 = math.tanh %29 : vector<16x256xf32>
    %c0_24 = arith.constant 0 : index
    %c0_25 = arith.constant 0 : index
    %38 = vector.load %arg12[%c0_24, %c0_25] : memref<16x1xf32, #tpu.memory_space<vmem>>, vector<16x1xf32>
    %39 = vector.broadcast %38 : vector<16x1xf32> to vector<16x256xf32>
    %40 = arith.mulf %39, %36 : vector<16x256xf32>
    %cst_26 = arith.constant 1.000000e+00 : f32
    %41 = vector.broadcast %cst_26 : f32 to vector<16x1xf32>
    %42 = arith.subf %41, %38 : vector<16x1xf32>
    %43 = vector.broadcast %42 : vector<16x1xf32> to vector<16x256xf32>
    %44 = arith.mulf %43, %37 : vector<16x256xf32>
    %45 = arith.addf %40, %44 : vector<16x256xf32>
    %c0_27 = arith.constant 0 : index
    %c0_28 = arith.constant 0 : index
    %46 = vector.load %arg10[%c0_27, %c0_28] : memref<16x1xf32, #tpu.memory_space<vmem>>, vector<16x1xf32>
    %47 = vector.broadcast %46 : vector<16x1xf32> to vector<16x256xf32>
    %48 = arith.mulf %45, %47 : vector<16x256xf32>
    %c0_29 = arith.constant 0 : index
    %c0_30 = arith.constant 0 : index
    %49 = vector.load %arg11[%c0_29, %c0_30] : memref<16x1xf32, #tpu.memory_space<vmem>>, vector<16x1xf32>
    %50 = vector.broadcast %49 : vector<16x1xf32> to vector<16x256xf32>
    %51 = arith.addf %48, %50 : vector<16x256xf32>
    %52 = vector.extract_strided_slice %51 {offsets = [0, 0], sizes = [1, 256], strides = [1, 1]} : vector<16x256xf32> to vector<1x256xf32>
    %53 = vector.extract_strided_slice %51 {offsets = [1, 0], sizes = [1, 256], strides = [1, 1]} : vector<16x256xf32> to vector<1x256xf32>
    %54 = vector.extract_strided_slice %51 {offsets = [2, 0], sizes = [1, 256], strides = [1, 1]} : vector<16x256xf32> to vector<1x256xf32>
    %55 = vector.extract_strided_slice %51 {offsets = [3, 0], sizes = [1, 256], strides = [1, 1]} : vector<16x256xf32> to vector<1x256xf32>
    %56 = vector.extract_strided_slice %51 {offsets = [4, 0], sizes = [1, 256], strides = [1, 1]} : vector<16x256xf32> to vector<1x256xf32>
    %57 = vector.extract_strided_slice %51 {offsets = [5, 0], sizes = [1, 256], strides = [1, 1]} : vector<16x256xf32> to vector<1x256xf32>
    %58 = vector.extract_strided_slice %51 {offsets = [6, 0], sizes = [1, 256], strides = [1, 1]} : vector<16x256xf32> to vector<1x256xf32>
    %59 = vector.extract_strided_slice %51 {offsets = [7, 0], sizes = [1, 256], strides = [1, 1]} : vector<16x256xf32> to vector<1x256xf32>
    %60 = vector.extract_strided_slice %51 {offsets = [8, 0], sizes = [1, 256], strides = [1, 1]} : vector<16x256xf32> to vector<1x256xf32>
    %61 = vector.extract_strided_slice %51 {offsets = [9, 0], sizes = [1, 256], strides = [1, 1]} : vector<16x256xf32> to vector<1x256xf32>
    %62 = vector.extract_strided_slice %51 {offsets = [10, 0], sizes = [1, 256], strides = [1, 1]} : vector<16x256xf32> to vector<1x256xf32>
    %63 = arith.subf %5, %59 : vector<1x256xf32>
    %64 = arith.mulf %57, %63 : vector<1x256xf32>
    %cst_31 = arith.constant 0.000000e+00 : f32
    %65 = vector.broadcast %cst_31 : f32 to vector<1x256xf32>
    %66 = arith.subf %65, %64 : vector<1x256xf32>
    %67 = arith.addf %58, %63 : vector<1x256xf32>
    %68 = arith.divf %66, %67 : vector<1x256xf32>
    %69 = arith.addf %54, %68 : vector<1x256xf32>
    %70 = arith.mulf %52, %3 : vector<1x256xf32>
    %71 = arith.addf %69, %70 : vector<1x256xf32>
    %72 = arith.subf %52, %53 : vector<1x256xf32>
    %73 = arith.mulf %72, %56 : vector<1x256xf32>
    %74 = arith.addf %69, %73 : vector<1x256xf32>
    %75 = arith.mulf %53, %3 : vector<1x256xf32>
    %76 = arith.addf %74, %75 : vector<1x256xf32>
    %cst_32 = arith.constant 0.000000e+00 : f32
    %77 = vector.broadcast %cst_32 : f32 to vector<1x256xf32>
    %78 = arith.subf %77, %55 : vector<1x256xf32>
    %79 = arith.subf %3, %56 : vector<1x256xf32>
    %80 = arith.mulf %78, %79 : vector<1x256xf32>
    %81 = math.exp %80 : vector<1x256xf32>
    %cst_33 = arith.constant 1.000000e+00 : f32
    %82 = vector.broadcast %cst_33 : f32 to vector<1x256xf32>
    %83 = arith.addf %82, %81 : vector<1x256xf32>
    %cst_34 = arith.constant 1.000000e+00 : f32
    %84 = vector.broadcast %cst_34 : f32 to vector<1x256xf32>
    %85 = arith.divf %84, %83 : vector<1x256xf32>
    %cst_35 = arith.constant 0.000000e+00 : f32
    %86 = vector.broadcast %cst_35 : f32 to vector<1x256xf32>
    %87 = arith.subf %86, %55 : vector<1x256xf32>
    %88 = arith.subf %56, %3 : vector<1x256xf32>
    %89 = arith.mulf %87, %88 : vector<1x256xf32>
    %90 = math.exp %89 : vector<1x256xf32>
    %cst_36 = arith.constant 1.000000e+00 : f32
    %91 = vector.broadcast %cst_36 : f32 to vector<1x256xf32>
    %92 = arith.addf %91, %90 : vector<1x256xf32>
    %cst_37 = arith.constant 1.000000e+00 : f32
    %93 = vector.broadcast %cst_37 : f32 to vector<1x256xf32>
    %94 = arith.divf %93, %92 : vector<1x256xf32>
    %95 = arith.mulf %71, %94 : vector<1x256xf32>
    %96 = arith.mulf %76, %85 : vector<1x256xf32>
    %97 = arith.addf %95, %96 : vector<1x256xf32>
    %98 = arith.subf %4, %61 : vector<1x256xf32>
    %99 = arith.mulf %62, %98 : vector<1x256xf32>
    %cst_38 = arith.constant 1.000000e+00 : f32
    %100 = vector.broadcast %cst_38 : f32 to vector<1x256xf32>
    %101 = arith.divf %100, %62 : vector<1x256xf32>
    %102 = arith.mulf %101, %60 : vector<1x256xf32>
    %cst_39 = arith.constant 0.000000e+00 : f32
    %103 = vector.broadcast %cst_39 : f32 to vector<1x256xf32>
    %104 = arith.subf %103, %99 : vector<1x256xf32>
    %105 = math.exp %104 : vector<1x256xf32>
    %cst_40 = arith.constant 1.000000e+00 : f32
    %106 = vector.broadcast %cst_40 : f32 to vector<1x256xf32>
    %107 = arith.addf %106, %105 : vector<1x256xf32>
    %108 = math.log %107 : vector<1x256xf32>
    %109 = arith.addf %108, %99 : vector<1x256xf32>
    %110 = arith.mulf %102, %109 : vector<1x256xf32>
    %111 = arith.subf %97, %110 : vector<1x256xf32>
    %c0_41 = arith.constant 0 : index
    %c0_42 = arith.constant 0 : index
    %112 = vector.load %arg13[%c0_41, %c0_42] : memref<1x256xf32, #tpu.memory_space<vmem>>, vector<1x256xf32>
    tpu.vector_store %arg13[%c0_41, %c0_42], %111 {strides = array<i32>} : memref<1x256xf32, #tpu.memory_space<vmem>>, vector<1x256xf32>,
    return
  }
  func.func @transform_0(%arg0: i32) -> (i32, i32) {
    %c0_i32 = arith.constant 0 : i32
    %c0_i32_0 = arith.constant 0 : i32
    return %c0_i32, %arg0 : i32, i32
  }
  func.func @transform_1(%arg0: i32) -> (i32, i32) {
    %c0_i32 = arith.constant 0 : i32
    %c0_i32_0 = arith.constant 0 : i32
    return %c0_i32, %arg0 : i32, i32
  }
  func.func @transform_2(%arg0: i32) -> (i32, i32) {
    %c0_i32 = arith.constant 0 : i32
    %c0_i32_0 = arith.constant 0 : i32
    %c0_i32_1 = arith.constant 0 : i32
    return %c0_i32, %c0_i32_0 : i32, i32
  }
  func.func @transform_3(%arg0: i32) -> (i32, i32) {
    %c0_i32 = arith.constant 0 : i32
    %c0_i32_0 = arith.constant 0 : i32
    %c0_i32_1 = arith.constant 0 : i32
    return %c0_i32, %c0_i32_0 : i32, i32
  }
  func.func @transform_4(%arg0: i32) -> (i32, i32) {
    %c0_i32 = arith.constant 0 : i32
    %c0_i32_0 = arith.constant 0 : i32
    %c0_i32_1 = arith.constant 0 : i32
    return %c0_i32, %c0_i32_0 : i32, i32
  }
  func.func @transform_5(%arg0: i32) -> (i32, i32) {
    %c0_i32 = arith.constant 0 : i32
    %c0_i32_0 = arith.constant 0 : i32
    %c0_i32_1 = arith.constant 0 : i32
    return %c0_i32, %c0_i32_0 : i32, i32
  }
  func.func @transform_6(%arg0: i32) -> (i32, i32) {
    %c0_i32 = arith.constant 0 : i32
    %c0_i32_0 = arith.constant 0 : i32
    %c0_i32_1 = arith.constant 0 : i32
    return %c0_i32, %c0_i32_0 : i32, i32
  }
  func.func @transform_7(%arg0: i32) -> (i32, i32) {
    %c0_i32 = arith.constant 0 : i32
    %c0_i32_0 = arith.constant 0 : i32
    %c0_i32_1 = arith.constant 0 : i32
    return %c0_i32, %c0_i32_0 : i32, i32
  }
  func.func @transform_8(%arg0: i32) -> (i32, i32) {
    %c0_i32 = arith.constant 0 : i32
    %c0_i32_0 = arith.constant 0 : i32
    %c0_i32_1 = arith.constant 0 : i32
    return %c0_i32, %c0_i32_0 : i32, i32
  }
  func.func @transform_9(%arg0: i32) -> (i32, i32) {
    %c0_i32 = arith.constant 0 : i32
    %c0_i32_0 = arith.constant 0 : i32
    %c0_i32_1 = arith.constant 0 : i32
    return %c0_i32, %c0_i32_0 : i32, i32
  }
  func.func @transform_10(%arg0: i32) -> (i32, i32) {
    %c0_i32 = arith.constant 0 : i32
    %c0_i32_0 = arith.constant 0 : i32
    %c0_i32_1 = arith.constant 0 : i32
    return %c0_i32, %c0_i32_0 : i32, i32
  }
  func.func @transform_11(%arg0: i32) -> (i32, i32) {
    %c0_i32 = arith.constant 0 : i32
    %c0_i32_0 = arith.constant 0 : i32
    %c0_i32_1 = arith.constant 0 : i32
    return %c0_i32, %c0_i32_0 : i32, i32
  }
  func.func @transform_12(%arg0: i32) -> (i32, i32) {
    %c0_i32 = arith.constant 0 : i32
    %c0_i32_0 = arith.constant 0 : i32
    return %c0_i32, %arg0 : i32, i32
  }
}

</mosaic_0001>

<bundles_post_ra>
// kernel: tpu_custom_call.1
= control target key start
LH: loop header
LB: loop body
LE: loop exit
PB: predicated region body
PF: predicated region fallthrough
CT: control target
= control target key end

     0   :  { %s3909_s0 = inlined_call_operand.vmem [shape: f32[16,300], index: 0, kind: input, shape index: {}]   ;;  %s3910_s1 = inlined_call_operand.vmem [shape: f32[8,300], index: 1, kind: input, shape index: {}]   ;;  %s3911_s2 = inlined_call_operand.vmem [shape: f32[128,16], index: 2, kind: input, shape index: {}]   ;;  %s3912_s3 = inlined_call_operand.vmem [shape: f32[128,1], index: 3, kind: input, shape index: {}]   ;;  %s3913_s4 = inlined_call_operand.vmem [shape: f32[128,1], index: 4, kind: input, shape index: {}]   ;;  %s3914_s5 = inlined_call_operand.vmem [shape: f32[128,128], index: 5, kind: input, shape index: {}]   ;;  %s3915_s6 = inlined_call_operand.vmem [shape: f32[128,1], index: 6, kind: input, shape index: {}]   ;;  %s3916_s7 = inlined_call_operand.vmem [shape: f32[16,128], index: 7, kind: input, shape index: {}]   ;;  %s3917_s8 = inlined_call_operand.vmem [shape: f32[16,1], index: 8, kind: input, shape index: {}]   ;;  %s3918_s9 = inlined_call_operand.vmem [shape: f32[16,1], index: 9, kind: input, shape index: {}]   ;;  %s3919_s10 = inlined_call_operand.vmem [shape: f32[16,1], index: 10, kind: input, shape index: {}]   ;;  %s3920_s11 = inlined_call_operand.vmem [shape: f32[16,1], index: 11, kind: input, shape index: {}]   ;;  %s3921_s12 = inlined_call_operand.hbm [shape: f32[1,300], index: 12, kind: output, shape index: {}]  }
   0x1   :  { %3940 = sst [smem:[#allocation19_spill]] %s3909_s0 }
   0x2   :  { %3941 = sst [smem:[#allocation20_spill]] %s3914_s5 }
   0x3   :  { %3942 = sst [smem:[#allocation21_spill]] %s3916_s7 }
   0x4   :  { %3943 = sst [smem:[#allocation22_spill]] %s3921_s12 }
   0x5   :  { %17 = vsyncpa [#allocation4], 0 }
   0x6   :  { %19 = vsyncpa [#allocation4 + $0x1], 0  ;;  %s2854_s21 = smov 0   ;;  %s2856_s22 = smov 0  }
   0x7   :  { %s2858_s23 = smov 0   ;;  %s2860_s24 = smov 0  }
   0x8 LB: > { %3944 = sst [smem:[#allocation6_spill]] %s2705_s21  ;;  %s2875_s25 = sadd.s32 4294967295, %s2717_s24   ;;  %s2717_s24 = sphi %s2860_s24, %s3986_s24   ;;  %s2713_s23 = sphi %s2858_s23, %s3988_s23   ;;  %s2709_s22 = sphi %s2856_s22, %s3990_s22   ;;  %s2705_s21 = sphi %s2854_s21, %s3989_s21  }
   0x9   : > { %3945 = sst [smem:[#allocation7_spill]] %s2713_s23  ;;  %s2296_s26 = sadd.s32 4294967294, %s2717_s24  }
   0xa   : > { %s2879_s27 = sadd.s32 1, %s2717_s24   ;;  %s32_s28 = sadd.s32 1, %s2713_s23 }
   0xb   : > { %3946 = sst [smem:[#allocation8_spill]] %s2879_s27  ;;  %s29_s29 = ssub.s32 %s2717_s24, %s2879_s27 }
   0xc   : > { %p39_p0 = scmp.ne.s32.totalorder %s2713_s23, %s2709_s22  ;;  %p30_p1 = scmp.eq.s32.totalorder %s29_s29, 0 }
   0xd   : > { %p40_p2 = scmp.eq.s32.totalorder %s2717_s24, 0  ;;  %p305_p3 = scmp.eq.s32.totalorder %s2875_s25, 1 }
   0xe   : > { %p310_p4 = scmp.ne.s32.totalorder %s2709_s22, %s2705_s21  ;;  %p311_p7 = scmp.eq.s32.totalorder %s2296_s26, 1 }
   0xf   : > { %s2891_s30 = scalar_select %p30_p1, %s2713_s23, %s32_s28  }
  0x10   : > { %p41_p5 = por %p40_p2, %p39_p0  ;;  %p2893_p6 = por %p305_p3, %p39_p0 }
  0x11   : > { %3947 = sst [smem:[#allocation9_spill]] %s2891_s30  ;;  %p2897_p8 = por %p311_p7, %p310_p4 }
  0x12   : > { %s3948_s13 = scalar_select %p2893_p6, 1, 0 }
  0x13   : > { %s3950_s14 = scalar_select %p2897_p8, 1, 0 }
  0x14   : > { %3949 = sst [smem:[#allocation10_spill]] %s3948_s13  ;;  %p2298_p9 = scmp.ge.s32.totalorder %s2717_s24, 2 }
  0x15   : > { %3951 = sst [smem:[#allocation11_spill]] %s3950_s14 }
  0x16   : > { %357 = sbr.rel (%p2298_p9) target bundleno = 152 (0x98), region = 56 }
  0x1b   : > { %360 = sbr.rel (!%p41_p5) target bundleno = 152 (0x98), region = 60  ;;  %s362_s15 = sand.u32 (%p41_p5), 1, %s2713_s23  }
  0x1c   : > { %s2300_s16 = sshll.u32 (%p41_p5), %s2717_s24, 1  ;;  %s2299_s17 = sshll.u32 (%p41_p5), %s362_s15, 5 }
  0x1d   : > { %s366_s18 = ssub.s32 (%p41_p5), 3, %s2300_s16  ;;  %s2356_s19 = sshll.u32 (%p41_p5), %s2717_s24, 4 }
  0x1e   : > { %p367_p10 = scmp.lt.s32.totalorder (%p41_p5), %s366_s18, 2  ;;  %s3952_s0 = sld [smem:[#allocation19_spill]] (%p41_p5) }
  0x1f   : > { %s2914_s27 = scalar_lea.vmem (%p41_p5), [#allocation2], %s2299_s17  }
  0x20   : > { %s3992_s18 = smov (!%p367_p10, %s366_s18), 2 }
  0x21   : > { %s2301_s29 = sshll.u32 %s3992_s18, 8  ;;  %s2912_s30 = sshll.u32 %s3992_s18, 3 }
  0x22   : > { %p2305_p11 = scmp.eq.s32.totalorder %s2301_s29, 0 }
  0x23   : > { %p377_p12 = scmp.lt.u32.totalorder (!%p2305_p11), %s2912_s30, 8 }
  0x24   : > { %s2910_s28 = scalar_lea.vmem %s3952_s0, %s2356_s19   ;;  %376 = sbr.rel (%p2305_p11) target bundleno = 152 (0x98), region = 64 }
  0x29   : > { %380 = sbr.rel (%p377_p12) target bundleno = 143 (0x8f), region = 68  ;;  %s2918_s15 = sand.u32 (!%p377_p12), 7, %s2912_s30  }
  0x2a   : > { %p399_p13 = scmp.eq.s32.totalorder (!%p377_p12), %s2918_s15, 0  ;;  %p2306_p0 = scmp.ne.s32.totalorder (!%p377_p12), %s2918_s15, 0 }
  0x2e   : > { %402 = sbr.rel (%p2306_p0) target bundleno = 93 (0x5d), region = 83  ;;  %s3924_s16 = sshrl.u32 (!%p2306_p0), %s2912_s30, 3 }
  0x2f   : > { %s2925_s18 = sshrl.u32 (!%p2306_p0), %s3924_s16, 5 }
  0x30   : > { %p2307_p1 = scmp.le.s32.totalorder (!%p2306_p0), %s2925_s18, 0 }
  0x33   : > { %2218 = sbr.rel (%p2307_p1) target bundleno = 75 (0x4b), region = 189  ;;  %s3953_s17 = smov (!%p2307_p1), %s2914_s27 }
  0x34   : > { %s3954_s19 = smov (!%p2307_p1), %s2910_s28  ;;  %s2934_s20 = smov (!%p2307_p1), 0  }
  0x35   : > { %s2936_s26 = smov (!%p2307_p1), 0  }
  0x38 LB: >> { %v422_v0 = vld [vmem:[%s2725_s19 + $0x18] sm:$0xff]  ;;  %v424_v1 = vld [vmem:[%s2725_s19 + $0x20] sm:$0xff]  ;;  %v426_v2 = vld [vmem:[%s2725_s19 + $0x28] sm:$0xff]  ;;  %s544_s29 = sadd.s32 1, %s2729_s20  ;;  %s410_s26 = sadd.s32 1, %s2733_s26   ;;  %s2733_s26 = sphi %s2936_s26, %s410_s26   ;;  %s2729_s20 = sphi %s2934_s20, %s3957_s20   ;;  %s2725_s19 = sphi %s3954_s19, %s3956_s19   ;;  %s2721_s17 = sphi %s3953_s17, %s3955_s17  }
  0x39   : >> { %v428_v3 = vld [vmem:[%s2725_s19 + $0x30] sm:$0xff]  ;;  %v430_v4 = vld [vmem:[%s2725_s19 + $0x38] sm:$0xff]  ;;  %v432_v5 = vld [vmem:[%s2725_s19 + $0x40] sm:$0xff]  ;;  %481 = vst [vmem:[%s2721_s17 + $0x10] sm:$0xff] %v422_v0  ;;  %p545_p2 = scmp.ge.s32.totalorder %s544_s29, %s2925_s18  ;;  %p409_p3 = scmp.ge.s32.totalorder %s410_s26, %s2925_s18 }
  0x3a   : >> { %483 = vst [vmem:[%s2721_s17 + $0x18] sm:$0xff] %v424_v1  ;;  %485 = vst [vmem:[%s2721_s17 + $0x20] sm:$0xff] %v426_v2  ;;  %v434_v6 = vld [vmem:[%s2725_s19 + $0x48] sm:$0xff]  ;;  %v436_v7 = vld [vmem:[%s2725_s19 + $0x50] sm:$0xff] }
  0x3b   : >> { %v438_v8 = vld [vmem:[%s2725_s19 + $0x58] sm:$0xff]  ;;  %487 = vst [vmem:[%s2721_s17 + $0x28] sm:$0xff] %v428_v3  ;;  %489 = vst [vmem:[%s2721_s17 + $0x30] sm:$0xff] %v430_v4  ;;  %v440_v9 = vld [vmem:[%s2725_s19 + $0x60] sm:$0xff]  ;;  %s3994_s29 = smov (%p545_p2, %s544_s29), 0 }
  0x3c   : >> { %491 = vst [vmem:[%s2721_s17 + $0x38] sm:$0xff] %v432_v5  ;;  %v442_v10 = vld [vmem:[%s2725_s19 + $0x68] sm:$0xff]  ;;  %v444_v11 = vld [vmem:[%s2725_s19 + $0x70] sm:$0xff]  ;;  %493 = vst [vmem:[%s2721_s17 + $0x40] sm:$0xff] %v434_v6  ;;  %s2308_s20 = sshll.u32 %s3994_s29, 8 }
  0x3d   : >> { %495 = vst [vmem:[%s2721_s17 + $0x48] sm:$0xff] %v436_v7  ;;  %497 = vst [vmem:[%s2721_s17 + $0x50] sm:$0xff] %v438_v8  ;;  %v446_v12 = vld [vmem:[%s2725_s19 + $0x78] sm:$0xff]  ;;  %v448_v13 = vld [vmem:[%s2725_s19 + $0x80] sm:$0xff]  ;;  %s549_s16 = scalar_lea.vmem %s2910_s28, %s2308_s20   ;;  %s550_s0 = scalar_lea.vmem %s2914_s27, %s2308_s20 [#allocation2]  }
  0x3e   : >> { %v450_v14 = vld [vmem:[%s2725_s19 + $0x88] sm:$0xff]  ;;  %499 = vst [vmem:[%s2721_s17 + $0x58] sm:$0xff] %v440_v9  ;;  %501 = vst [vmem:[%s2721_s17 + $0x60] sm:$0xff] %v442_v10  ;;  %v452_v15 = vld [vmem:[%s2725_s19 + $0x90] sm:$0xff]  ;;  %s3957_s20 = smov %s3994_s29 }
  0x3f   : >> { %503 = vst [vmem:[%s2721_s17 + $0x68] sm:$0xff] %v444_v11  ;;  %v454_v16 = vld [vmem:[%s2725_s19 + $0x98] sm:$0xff]  ;;  %v456_v17 = vld [vmem:[%s2725_s19 + $0xa0] sm:$0xff]  ;;  %505 = vst [vmem:[%s2721_s17 + $0x70] sm:$0xff] %v446_v12 }
  0x40   : >> { %507 = vst [vmem:[%s2721_s17 + $0x78] sm:$0xff] %v448_v13  ;;  %509 = vst [vmem:[%s2721_s17 + $0x80] sm:$0xff] %v450_v14  ;;  %v458_v18 = vld [vmem:[%s2725_s19 + $0xa8] sm:$0xff]  ;;  %v460_v19 = vld [vmem:[%s2725_s19 + $0xb0] sm:$0xff] }
  0x41   : >> { %v462_v20 = vld [vmem:[%s2725_s19 + $0xb8] sm:$0xff]  ;;  %511 = vst [vmem:[%s2721_s17 + $0x88] sm:$0xff] %v452_v15  ;;  %513 = vst [vmem:[%s2721_s17 + $0x90] sm:$0xff] %v454_v16  ;;  %v464_v21 = vld [vmem:[%s2725_s19 + $0xc0] sm:$0xff] }
  0x42   : >> { %515 = vst [vmem:[%s2721_s17 + $0x98] sm:$0xff] %v456_v17  ;;  %v466_v22 = vld [vmem:[%s2725_s19 + $0xc8] sm:$0xff]  ;;  %v468_v23 = vld [vmem:[%s2725_s19 + $0xd0] sm:$0xff]  ;;  %517 = vst [vmem:[%s2721_s17 + $0xa0] sm:$0xff] %v458_v18 }
  0x43   : >> { %519 = vst [vmem:[%s2721_s17 + $0xa8] sm:$0xff] %v460_v19  ;;  %521 = vst [vmem:[%s2721_s17 + $0xb0] sm:$0xff] %v462_v20  ;;  %v470_v24 = vld [vmem:[%s2725_s19 + $0xd8] sm:$0xff]  ;;  %v472_v25 = vld [vmem:[%s2725_s19 + $0xe0] sm:$0xff] }
  0x44   : >> { %v474_v26 = vld [vmem:[%s2725_s19 + $0xe8] sm:$0xff]  ;;  %523 = vst [vmem:[%s2721_s17 + $0xb8] sm:$0xff] %v464_v21  ;;  %525 = vst [vmem:[%s2721_s17 + $0xc0] sm:$0xff] %v466_v22  ;;  %v476_v27 = vld [vmem:[%s2725_s19 + $0xf0] sm:$0xff] }
  0x45   : >> { %527 = vst [vmem:[%s2721_s17 + $0xc8] sm:$0xff] %v468_v23  ;;  %v478_v28 = vld [vmem:[%s2725_s19 + $0xf8] sm:$0xff]  ;;  %v416_v29 = vld [vmem:[%s2725_s19] sm:$0xff]  ;;  %529 = vst [vmem:[%s2721_s17 + $0xd0] sm:$0xff] %v470_v24 }
  0x46   : >> { %531 = vst [vmem:[%s2721_s17 + $0xd8] sm:$0xff] %v472_v25  ;;  %533 = vst [vmem:[%s2721_s17 + $0xe0] sm:$0xff] %v474_v26  ;;  %v418_v30 = vld [vmem:[%s2725_s19 + $0x8] sm:$0xff]  ;;  %v538_v31 = vld [vmem:[%s2725_s19 + $0x100] sm:$0xff]  ;;  %412 = sbr.rel (!%p409_p3) target bundleno = 56 (0x38), region = 195 }
  0x47   : >> { %417 = vst [vmem:[%s2721_s17] sm:$0xff] %v416_v29  ;;  %535 = vst [vmem:[%s2721_s17 + $0xe8] sm:$0xff] %v476_v27  ;;  %v540_v32 = vld [vmem:[%s2725_s19 + $0x108] sm:$0xff]  ;;  %v542_v33 = vld [vmem:[%s2725_s19 + $0x110] sm:$0xff]  ;;  %s3956_s19 = smov %s549_s16 }
  0x48   : >> { %537 = vst [vmem:[%s2721_s17 + $0xf0] sm:$0xff] %v478_v28  ;;  %419 = vst [vmem:[%s2721_s17 + $0x8] sm:$0xff] %v418_v30 }
  0x49   : >> { %539 = vst [vmem:[%s2721_s17 + $0xf8] sm:$0xff] %v538_v31  ;;  %541 = vst [vmem:[%s2721_s17 + $0x100] sm:$0xff] %v540_v32 }
  0x4a   : >> { %543 = vst [vmem:[%s2721_s17 + $0x108] sm:$0xff] %v542_v33  ;;  %s3955_s17 = smov %s550_s0 }
  0x4b PF: > { %s3958_s23 = sshrl.u32 %s2912_s30, 3  ;;  %s2357_s21 = sshll.u32 %s2925_s18, 12 }
  0x4c   : > { %s3038_s14 = sand.u32 31, %s3958_s23   ;;  %s555_s12 = sshra.s32 %s2357_s21, 4 }
  0x4d   : > { %s3042_s13 = scalar_lea.vmem %s2910_s28, %s555_s12   ;;  %s559_s0 = scalar_lea.vmem %s2914_s27, %s555_s12 [#allocation2]  }
  0x4e   : > { %p2313_p4 = scmp.le.s32.totalorder %s3038_s14, 0 }
  0x4f   : > { %s2735_s16 = smov (!%p2313_p4), %s559_s0   ;;  %s2739_s26 = smov (!%p2313_p4), %s3042_s13  }
  0x50   : > { %2232 = sbr.rel (%p2313_p4) target bundleno = 93 (0x5d), region = 200  ;;  %s2743_s29 = smov (!%p2313_p4), 0  }
  0x51   : > { %s2747_s17 = smov (!%p2313_p4), 0  }
  0x55 LB: >> { %v571_v34 = vld [vmem:[%s2741_s26] sm:$0xff]  ;;  %v573_v35 = vld [vmem:[%s2741_s26 + $0x18] sm:$0xff]  ;;  %s575_s21 = sadd.s32 1, %s2745_s29  ;;  %s565_s17 = sadd.s32 1, %s2749_s17   ;;  %s2749_s17 = sphi %s2747_s17, %s565_s17   ;;  %s2745_s29 = sphi %s2743_s29, %s2744_s29   ;;  %s2741_s26 = sphi %s2739_s26, %s580_s26   ;;  %s2737_s16 = sphi %s2735_s16, %s581_s16  }
  0x56   : >> { %572 = vst [vmem:[%s2737_s16] sm:$0xff] %v571_v34  ;;  %574 = vst [vmem:[%s2737_s16 + $0x10] sm:$0xff] %v573_v35  ;;  %p576_p5 = scmp.ge.s32.totalorder %s575_s21, %s3038_s14  ;;  %p564_p7 = scmp.ge.s32.totalorder %s565_s17, %s3038_s14 }
  0x58   : >> { %s3996_s21 = smov (%p576_p5, %s575_s21), 0  ;;  %567 = sbr.rel (!%p564_p7) target bundleno = 85 (0x55), region = 206 }
  0x59   : >> { %s2314_s12 = sshll.u32 %s3996_s21, 3  ;;  %s2744_s29 = smov %s3996_s21  }
  0x5a   : >> { %s580_s26 = scalar_lea.vmem %s3042_s13, %s2314_s12   ;;  %s581_s16 = scalar_lea.vmem %s559_s0, %s2314_s12 [#allocation2]  }
  0x5d PF: > { %584 = sbr.rel (%p399_p13) target bundleno = 143 (0x8f), region = 101  ;;  %s586_s23 = ssub.s32 (!%p399_p13), %s2912_s30, %s2918_s15 }
  0x5e   : > { %s590_s18 = sshrl.u32 (!%p399_p13), %s2912_s30, 3  ;;  %s3056_s19 = scalar_lea.vmem (!%p399_p13), %s2910_s28, %s586_s23 }
  0x5f   : > { %s3059_s20 = scalar_lea.vmem (!%p399_p13), %s2914_s27, %s586_s23 [#allocation2]  ;;  %s3063_s16 = sshrl.u32 (!%p399_p13), %s590_s18, 5 }
  0x60   : > { %p2316_p10 = scmp.le.s32.totalorder (!%p399_p13), %s3063_s16, 0 }
  0x62   : > { %2246 = sbr.rel (%p2316_p10) target bundleno = 122 (0x7a), region = 211  ;;  %s3959_s13 = smov (!%p2316_p10), %s2914_s27 }
  0x63   : > { %s3960_s14 = smov (!%p2316_p10), %s2910_s28  ;;  %s3072_s0 = smov (!%p2316_p10), 0  }
  0x64   : > { %s3074_s26 = smov (!%p2316_p10), 0  }
  0x67 LB: >> { %v609_v36 = vld [vmem:[%s2757_s14 + $0x18] sm:$0xff]  ;;  %v611_v37 = vld [vmem:[%s2757_s14 + $0x20] sm:$0xff]  ;;  %v613_v38 = vld [vmem:[%s2757_s14 + $0x28] sm:$0xff]  ;;  %s731_s29 = sadd.s32 1, %s2761_s0  ;;  %s597_s26 = sadd.s32 1, %s2765_s26   ;;  %s2765_s26 = sphi %s3074_s26, %s597_s26   ;;  %s2761_s0 = sphi %s3072_s0, %s3963_s0   ;;  %s2757_s14 = sphi %s3960_s14, %s3962_s14   ;;  %s2753_s13 = sphi %s3959_s13, %s3961_s13  }
  0x68   : >> { %v615_v39 = vld [vmem:[%s2757_s14 + $0x30] sm:$0xff]  ;;  %v617_v40 = vld [vmem:[%s2757_s14 + $0x38] sm:$0xff]  ;;  %v619_v41 = vld [vmem:[%s2757_s14 + $0x40] sm:$0xff]  ;;  %668 = vst [vmem:[%s2753_s13 + $0x10] sm:$0xff] %v609_v36  ;;  %p732_p11 = scmp.ge.s32.totalorder %s731_s29, %s3063_s16  ;;  %p596_p12 = scmp.ge.s32.totalorder %s597_s26, %s3063_s16 }
  0x69   : >> { %670 = vst [vmem:[%s2753_s13 + $0x18] sm:$0xff] %v611_v37  ;;  %672 = vst [vmem:[%s2753_s13 + $0x20] sm:$0xff] %v613_v38  ;;  %v621_v42 = vld [vmem:[%s2757_s14 + $0x48] sm:$0xff]  ;;  %v623_v43 = vld [vmem:[%s2757_s14 + $0x50] sm:$0xff] }
  0x6a   : >> { %v625_v44 = vld [vmem:[%s2757_s14 + $0x58] sm:$0xff]  ;;  %674 = vst [vmem:[%s2753_s13 + $0x28] sm:$0xff] %v615_v39  ;;  %676 = vst [vmem:[%s2753_s13 + $0x30] sm:$0xff] %v617_v40  ;;  %v627_v45 = vld [vmem:[%s2757_s14 + $0x60] sm:$0xff]  ;;  %s3998_s29 = smov (%p732_p11, %s731_s29), 0 }
  0x6b   : >> { %678 = vst [vmem:[%s2753_s13 + $0x38] sm:$0xff] %v619_v41  ;;  %v629_v46 = vld [vmem:[%s2757_s14 + $0x68] sm:$0xff]  ;;  %v631_v47 = vld [vmem:[%s2757_s14 + $0x70] sm:$0xff]  ;;  %680 = vst [vmem:[%s2753_s13 + $0x40] sm:$0xff] %v621_v42  ;;  %s2317_s17 = sshll.u32 %s3998_s29, 8  ;;  %s3963_s0 = smov %s3998_s29 }
  0x6c   : >> { %682 = vst [vmem:[%s2753_s13 + $0x48] sm:$0xff] %v623_v43  ;;  %684 = vst [vmem:[%s2753_s13 + $0x50] sm:$0xff] %v625_v44  ;;  %v633_v48 = vld [vmem:[%s2757_s14 + $0x78] sm:$0xff]  ;;  %v635_v49 = vld [vmem:[%s2757_s14 + $0x80] sm:$0xff]  ;;  %s736_s21 = scalar_lea.vmem %s2910_s28, %s2317_s17   ;;  %s737_s12 = scalar_lea.vmem %s2914_s27, %s2317_s17 [#allocation2]  }
  0x6d   : >> { %v637_v50 = vld [vmem:[%s2757_s14 + $0x88] sm:$0xff]  ;;  %686 = vst [vmem:[%s2753_s13 + $0x58] sm:$0xff] %v627_v45  ;;  %688 = vst [vmem:[%s2753_s13 + $0x60] sm:$0xff] %v629_v46  ;;  %v639_v51 = vld [vmem:[%s2757_s14 + $0x90] sm:$0xff] }
  0x6e   : >> { %690 = vst [vmem:[%s2753_s13 + $0x68] sm:$0xff] %v631_v47  ;;  %v641_v52 = vld [vmem:[%s2757_s14 + $0x98] sm:$0xff]  ;;  %v643_v53 = vld [vmem:[%s2757_s14 + $0xa0] sm:$0xff]  ;;  %692 = vst [vmem:[%s2753_s13 + $0x70] sm:$0xff] %v633_v48 }
  0x6f   : >> { %694 = vst [vmem:[%s2753_s13 + $0x78] sm:$0xff] %v635_v49  ;;  %696 = vst [vmem:[%s2753_s13 + $0x80] sm:$0xff] %v637_v50  ;;  %v645_v54 = vld [vmem:[%s2757_s14 + $0xa8] sm:$0xff]  ;;  %v647_v55 = vld [vmem:[%s2757_s14 + $0xb0] sm:$0xff] }
  0x70   : >> { %v649_v56 = vld [vmem:[%s2757_s14 + $0xb8] sm:$0xff]  ;;  %698 = vst [vmem:[%s2753_s13 + $0x88] sm:$0xff] %v639_v51  ;;  %700 = vst [vmem:[%s2753_s13 + $0x90] sm:$0xff] %v641_v52  ;;  %v651_v57 = vld [vmem:[%s2757_s14 + $0xc0] sm:$0xff] }
  0x71   : >> { %702 = vst [vmem:[%s2753_s13 + $0x98] sm:$0xff] %v643_v53  ;;  %v653_v58 = vld [vmem:[%s2757_s14 + $0xc8] sm:$0xff]  ;;  %v655_v59 = vld [vmem:[%s2757_s14 + $0xd0] sm:$0xff]  ;;  %704 = vst [vmem:[%s2753_s13 + $0xa0] sm:$0xff] %v645_v54 }
  0x72   : >> { %706 = vst [vmem:[%s2753_s13 + $0xa8] sm:$0xff] %v647_v55  ;;  %708 = vst [vmem:[%s2753_s13 + $0xb0] sm:$0xff] %v649_v56  ;;  %v657_v60 = vld [vmem:[%s2757_s14 + $0xd8] sm:$0xff]  ;;  %v659_v61 = vld [vmem:[%s2757_s14 + $0xe0] sm:$0xff] }
  0x73   : >> { %v661_v62 = vld [vmem:[%s2757_s14 + $0xe8] sm:$0xff]  ;;  %710 = vst [vmem:[%s2753_s13 + $0xb8] sm:$0xff] %v651_v57  ;;  %712 = vst [vmem:[%s2753_s13 + $0xc0] sm:$0xff] %v653_v58  ;;  %v663_v63 = vld [vmem:[%s2757_s14 + $0xf0] sm:$0xff] }
  0x74   : >> { %714 = vst [vmem:[%s2753_s13 + $0xc8] sm:$0xff] %v655_v59  ;;  %v665_v0 = vld [vmem:[%s2757_s14 + $0xf8] sm:$0xff]  ;;  %v603_v1 = vld [vmem:[%s2757_s14] sm:$0xff]  ;;  %716 = vst [vmem:[%s2753_s13 + $0xd0] sm:$0xff] %v657_v60 }
  0x75   : >> { %718 = vst [vmem:[%s2753_s13 + $0xd8] sm:$0xff] %v659_v61  ;;  %720 = vst [vmem:[%s2753_s13 + $0xe0] sm:$0xff] %v661_v62  ;;  %v605_v2 = vld [vmem:[%s2757_s14 + $0x8] sm:$0xff]  ;;  %v725_v3 = vld [vmem:[%s2757_s14 + $0x100] sm:$0xff]  ;;  %599 = sbr.rel (!%p596_p12) target bundleno = 103 (0x67), region = 217 }
  0x76   : >> { %604 = vst [vmem:[%s2753_s13] sm:$0xff] %v603_v1  ;;  %722 = vst [vmem:[%s2753_s13 + $0xe8] sm:$0xff] %v663_v63  ;;  %v727_v4 = vld [vmem:[%s2757_s14 + $0x108] sm:$0xff]  ;;  %v729_v5 = vld [vmem:[%s2757_s14 + $0x110] sm:$0xff]  ;;  %s3962_s14 = smov %s736_s21 }
  0x77   : >> { %724 = vst [vmem:[%s2753_s13 + $0xf0] sm:$0xff] %v665_v0  ;;  %606 = vst [vmem:[%s2753_s13 + $0x8] sm:$0xff] %v605_v2 }
  0x78   : >> { %726 = vst [vmem:[%s2753_s13 + $0xf8] sm:$0xff] %v725_v3  ;;  %728 = vst [vmem:[%s2753_s13 + $0x100] sm:$0xff] %v727_v4 }
  0x79   : >> { %730 = vst [vmem:[%s2753_s13 + $0x108] sm:$0xff] %v729_v5  ;;  %s3961_s13 = smov %s737_s12 }
  0x7a PF: > { %s3176_s23 = sand.u32 31, %s590_s18   ;;  %s2359_s17 = sshll.u32 %s3063_s16, 12 }
  0x7b   : > { %s742_s7 = sshra.s32 %s2359_s17, 4  ;;  %p2322_p13 = scmp.le.s32.totalorder %s3176_s23, 0 }
  0x7c   : > { %s3180_s5 = scalar_lea.vmem %s2910_s28, %s742_s7   ;;  %s746_s12 = scalar_lea.vmem %s2914_s27, %s742_s7 [#allocation2]  }
  0x7d   : > { %2260 = sbr.rel (%p2322_p13) target bundleno = 138 (0x8a), region = 222  ;;  %s2767_s29 = smov (!%p2322_p13), %s746_s12  }
  0x7e   : > { %s2771_s26 = smov (!%p2322_p13), %s3180_s5   ;;  %s2775_s21 = smov (!%p2322_p13), 0  }
  0x7f   : > { %s2779_s13 = smov (!%p2322_p13), 0  }
  0x82 LB: >> { %v758_v6 = vld [vmem:[%s2773_s26] sm:$0xff]  ;;  %v760_v7 = vld [vmem:[%s2773_s26 + $0x18] sm:$0xff]  ;;  %s762_s18 = sadd.s32 1, %s2777_s21  ;;  %s752_s13 = sadd.s32 1, %s2781_s13   ;;  %s2781_s13 = sphi %s2779_s13, %s752_s13   ;;  %s2777_s21 = sphi %s2775_s21, %s2776_s21   ;;  %s2773_s26 = sphi %s2771_s26, %s767_s26   ;;  %s2769_s29 = sphi %s2767_s29, %s768_s29  }
  0x83   : >> { %759 = vst [vmem:[%s2769_s29] sm:$0xff] %v758_v6  ;;  %761 = vst [vmem:[%s2769_s29 + $0x10] sm:$0xff] %v760_v7  ;;  %p763_p0 = scmp.ge.s32.totalorder %s762_s18, %s3176_s23  ;;  %p751_p1 = scmp.ge.s32.totalorder %s752_s13, %s3176_s23 }
  0x85   : >> { %s4000_s18 = smov (%p763_p0, %s762_s18), 0  ;;  %754 = sbr.rel (!%p751_p1) target bundleno = 130 (0x82), region = 228 }
  0x86   : >> { %s2323_s7 = sshll.u32 %s4000_s18, 3  ;;  %s2776_s21 = smov %s4000_s18  }
  0x87   : >> { %s767_s26 = scalar_lea.vmem %s3180_s5, %s2323_s7   ;;  %s768_s29 = scalar_lea.vmem %s746_s12, %s2323_s7 [#allocation2]  }
  0x8a PF: > { %s2783_s16 = smov 1  }
  0x8b   : > { %s769_s14 = sshll.u32 %s2783_s16, %s2918_s15 }
  0x8c   : > { %s2325_s0 = sadd.s32 4294967295, %s769_s14 }
  0x8d   : > { %v779_v8 = vld [vmem:[%s3056_s19] sm:%s2325_s0]  ;;  %v781_v9 = vld [vmem:[%s3056_s19 + $0x18] sm:%s2325_s0] }
  0x8e   : > { %780 = vst [vmem:[%s3059_s20] sm:%s2325_s0] %v779_v8  ;;  %782 = vst [vmem:[%s3059_s20 + $0x10] sm:%s2325_s0] %v781_v9 }
  0x8f PF: > { %p2326_p2 = scmp.ge.u32.totalorder %s2912_s30, 8 }
  0x90   : > { %s2784_s17 = smov (!%p2326_p2), 1  }
  0x91   : > { %383 = sbr.rel (%p2326_p2) target bundleno = 152 (0x98), region = 72  ;;  %s384_s5 = sshll.u32 (!%p2326_p2), %s2784_s17, %s2912_s30 }
  0x92   : > { %s2327_s23 = sadd.s32 (!%p2326_p2), 4294967295, %s384_s5 }
  0x96   : > { %v394_v10 = vld [vmem:[%s2910_s28] sm:%s2327_s23]  ;;  %v396_v11 = vld [vmem:[%s2910_s28 + $0x18] sm:%s2327_s23] }
  0x97   : > { %395 = vst [vmem:[%s2914_s27] sm:%s2327_s23] %v394_v10  ;;  %397 = vst [vmem:[%s2914_s27 + $0x10] sm:%s2327_s23] %v396_v11 }
  0x98 PF: > { %p2328_p3 = scmp.ge.s32.totalorder %s2717_s24, 1  ;;  %p802_p4 = scmp.lt.s32.totalorder %s2717_s24, 3 }
  0x9a   : > { %p803_p5 = pnand %p2328_p3, %p802_p4 }
  0x9c   : > { %806 = sbr.rel (%p803_p5) target bundleno = 1086 (0x43e), region = 130 }
  0xa1   : > { %v920_v12 = vld [vmem:[%s3912_s3 + $0x78] sm:$0xff]  ;;  %v918_v13 = vld [vmem:[%s3912_s3 + $0x68] sm:$0xff]  ;;  %s3208_s27 = sand.u32 1, %s2709_s22   ;;  %v2785_v14 = vmov 0   ;;  %v919_v15 = vld [vmem:[%s3912_s3 + $0x70] sm:$0xff]  ;;  %v3933_v19 = vmov 0.0  }
  0xa2   : > { %2534 = vset.pattern.permute.xlu1 %v2785_v14  ;;  %2533 = vset.pattern.permute.xlu0 %v2785_v14  ;;  %s2329_s28 = sshll.u32 %s3208_s27, 5  ;;  %v1266_v18 = vld [vmem:[%s3913_s4 + $0x78] sm:$0xff]  ;;  %v889_v22 = vld [vmem:[%s3911_s2] sm:$0xff]  ;;  %vm1041_vm0 = vcmask 130048   ;;  %v1265_v23 = vld [vmem:[%s3913_s4 + $0x70] sm:$0xff]  ;;  %s3518_s30 = sshll.u32 %s2875_s25, 1 }
  0xa3   : > { %998 = vperm.xlu0 %2533, %v920_v12   ;;  %988 = vperm.xlu1 %2534, %v918_v13   ;;  %s811_s26 = scalar_lea.vmem [#allocation2], %s2329_s28  ;;  %v917_v24 = vld [vmem:[%s3912_s3 + $0x60] sm:$0xff]  ;;  %v890_v25 = vld [vmem:[%s3911_s2 + $0x8] sm:$0xff]  ;;  %v916_v27 = vld [vmem:[%s3912_s3 + $0x58] sm:$0xff]  ;;  %p869_p7 = scmp.lt.s32.totalorder %s3518_s30, 2 }
  0xa4   : > { %v886_v16 = vld [vmem:[%s811_s26 + $0x18] sm:$0xff]  ;;  %v885_v17 = vld [vmem:[%s811_s26 + $0x10] sm:$0xff]  ;;  %1154 = vmatprep.mubr.f32.mxu0 %v3933_v19  ;;  %1587 = vmatprep.mubr.f32.mxu1 %v3933_v19  ;;  %v884_v20 = vld [vmem:[%s811_s26 + $0x8] sm:$0xff]  ;;  %s3975_s18 = sld [smem:[#allocation20_spill]]  ;;  %s2118_s23 = scalar_lea.sflag [#allocation4], %s3208_s27 }
  0xa5   : > { %1118 = vmatprep.subr.mxu0 %v886_v16  ;;  %v883_v21 = vld [vmem:[%s811_s26] sm:$0xff]  ;;  %v1264_v26 = vld [vmem:[%s3913_s4 + $0x68] sm:$0xff]  ;;  %v891_v28 = vld [vmem:[%s3911_s2 + $0x10] sm:$0xff]  ;;  %s870_s20 = scalar_select %p869_p7, %s3518_s30, 2 }
  0xa6   : > { %1119 = vmatpush1.msra.mxu0 %v885_v17  ;;  %v1263_v29 = vld [vmem:[%s3913_s4 + $0x60] sm:$0xff]  ;;  %v915_v30 = vld [vmem:[%s3912_s3 + $0x50] sm:$0xff]  ;;  %v892_v31 = vld [vmem:[%s3911_s2 + $0x18] sm:$0xff]  ;;  %s3977_s14 = sld [smem:[#allocation21_spill]]  ;;  %s2126_s19 = ssub.s32 (%p2893_p6), 3, %s3518_s30 }
  0xa7   : > { %993 = vperm.xlu0 %2533, %v919_v15   ;;  %1344 = vperm.xlu1 %2534, %v1266_v18   ;;  %v1262_v32 = vld [vmem:[%s3913_s4 + $0x58] sm:$0xff]  ;;  %v914_v33 = vld [vmem:[%s3912_s3 + $0x48] sm:$0xff]  ;;  %v893_v34 = vld [vmem:[%s3911_s2 + $0x20] sm:$0xff]  ;;  %s2332_s28 = sshll.u32 %s870_s20, 3  ;;  %p2127_p10 = scmp.lt.s32.totalorder (%p2893_p6), %s2126_s19, 2 }
  0xa8   : > { %1120 = vmatprep.subr.mxu0 %v884_v20  ;;  %v1261_v35 = vld [vmem:[%s3913_s4 + $0x50] sm:$0xff]  ;;  %v913_v36 = vld [vmem:[%s3912_s3 + $0x40] sm:$0xff]  ;;  %v894_v37 = vld [vmem:[%s3911_s2 + $0x28] sm:$0xff]  ;;  %s3544_s26 = scalar_lea.vmem %s3910_s1, %s2332_s28 }
  0xa9   : > { %1121 = vmatpush1.msra.mxu0 %v883_v21  ;;  %v1260_v38 = vld [vmem:[%s3913_s4 + $0x48] sm:$0xff]  ;;  %v912_v39 = vld [vmem:[%s3912_s3 + $0x38] sm:$0xff]  ;;  %v895_v40 = vld [vmem:[%s3911_s2 + $0x30] sm:$0xff] }
  0xaa   : > { %2333 = vmatmul.mubr.msk.f32.vlgmr.msra.gmra.mxu0 %vm1041_vm0, %v889_v22  ;;  %v1259_v41 = vld [vmem:[%s3913_s4 + $0x40] sm:$0xff]  ;;  %v911_v42 = vld [vmem:[%s3912_s3 + $0x30] sm:$0xff]  ;;  %v896_v43 = vld [vmem:[%s3911_s2 + $0x38] sm:$0xff] }
  0xab   : > { %1339 = vperm.xlu1 %2534, %v1265_v23   ;;  %983 = vperm.xlu0 %2533, %v917_v24   ;;  %v1258_v44 = vld [vmem:[%s3913_s4 + $0x38] sm:$0xff]  ;;  %v910_v45 = vld [vmem:[%s3912_s3 + $0x28] sm:$0xff]  ;;  %v897_v46 = vld [vmem:[%s3911_s2 + $0x40] sm:$0xff] }
  0xac   : > { %1160 = vmatprep.mubr.f32.mxu0 %v3933_v19  ;;  %v1257_v47 = vld [vmem:[%s3913_s4 + $0x30] sm:$0xff]  ;;  %v909_v48 = vld [vmem:[%s3912_s3 + $0x20] sm:$0xff]  ;;  %v898_v49 = vld [vmem:[%s3911_s2 + $0x48] sm:$0xff] }
  0xad   : > { %v1256_v50 = vld [vmem:[%s3913_s4 + $0x28] sm:$0xff]  ;;  %v908_v51 = vld [vmem:[%s3912_s3 + $0x18] sm:$0xff]  ;;  %v899_v52 = vld [vmem:[%s3911_s2 + $0x50] sm:$0xff] }
  0xae   : > { %2334 = vmatmul.mubr.msk.f32.gmra.mxu0 %vm1041_vm0, %v890_v25  ;;  %v1255_v53 = vld [vmem:[%s3913_s4 + $0x20] sm:$0xff]  ;;  %v907_v54 = vld [vmem:[%s3912_s3 + $0x10] sm:$0xff]  ;;  %v900_v55 = vld [vmem:[%s3911_s2 + $0x58] sm:$0xff] }
  0xaf   : > { %1334 = vperm.xlu1 %2534, %v1264_v26   ;;  %978 = vperm.xlu0 %2533, %v916_v27   ;;  %v1254_v56 = vld [vmem:[%s3913_s4 + $0x18] sm:$0xff]  ;;  %v906_v57 = vld [vmem:[%s3912_s3 + $0x8] sm:$0xff]  ;;  %v901_v58 = vld [vmem:[%s3911_s2 + $0x60] sm:$0xff] }
  0xb0   : > { %1166 = vmatprep.mubr.f32.mxu0 %v3933_v19  ;;  %v1253_v59 = vld [vmem:[%s3913_s4 + $0x10] sm:$0xff]  ;;  %v905_v60 = vld [vmem:[%s3912_s3] sm:$0xff]  ;;  %v902_v61 = vld [vmem:[%s3911_s2 + $0x68] sm:$0xff] }
  0xb1   : > { %v1251_v62 = vld [vmem:[%s3913_s4] sm:$0xff]  ;;  %v1252_v63 = vld [vmem:[%s3913_s4 + $0x8] sm:$0xff]  ;;  %v903_v0 = vld [vmem:[%s3911_s2 + $0x70] sm:$0xff] }
  0xb2   : > { %2335 = vmatmul.mubr.msk.f32.gmra.mxu0 %vm1041_vm0, %v891_v28  ;;  %v1441_v1 = vld [vmem:[%s3915_s6 + $0x70] sm:$0xff]  ;;  %v1442_v2 = vld [vmem:[%s3915_s6 + $0x78] sm:$0xff]  ;;  %v1439_v4 = vld [vmem:[%s3915_s6 + $0x60] sm:$0xff] }
  0xb3   : > { %1329 = vperm.xlu1 %2534, %v1263_v29   ;;  %973 = vperm.xlu0 %2533, %v915_v30   ;;  %v904_v3 = vld [vmem:[%s3911_s2 + $0x78] sm:$0xff]  ;;  %v1440_v5 = vld [vmem:[%s3915_s6 + $0x68] sm:$0xff]  ;;  %v1437_v6 = vld [vmem:[%s3915_s6 + $0x50] sm:$0xff] }
  0xb4   : > { %1172 = vmatprep.mubr.f32.mxu0 %v3933_v19  ;;  %v1438_v7 = vld [vmem:[%s3915_s6 + $0x58] sm:$0xff]  ;;  %v1435_v8 = vld [vmem:[%s3915_s6 + $0x40] sm:$0xff]  ;;  %v1436_v9 = vld [vmem:[%s3915_s6 + $0x48] sm:$0xff] }
  0xb5   : > { %v1433_v10 = vld [vmem:[%s3915_s6 + $0x30] sm:$0xff]  ;;  %v1434_v11 = vld [vmem:[%s3915_s6 + $0x38] sm:$0xff]  ;;  %v1431_v12 = vld [vmem:[%s3915_s6 + $0x20] sm:$0xff] }
  0xb6   : > { %2336 = vmatmul.mubr.msk.f32.gmra.mxu0 %vm1041_vm0, %v892_v31  ;;  %v1432_v13 = vld [vmem:[%s3915_s6 + $0x28] sm:$0xff]  ;;  %v1429_v14 = vld [vmem:[%s3915_s6 + $0x10] sm:$0xff]  ;;  %v1430_v15 = vld [vmem:[%s3915_s6 + $0x18] sm:$0xff] }
  0xb7   : > { %1324 = vperm.xlu1 %2534, %v1262_v32   ;;  %968 = vperm.xlu0 %2533, %v914_v33   ;;  %v1427_v16 = vld [vmem:[%s3915_s6] sm:$0xff]  ;;  %v1428_v17 = vld [vmem:[%s3915_s6 + $0x8] sm:$0xff] }
  0xb8   : > { %1178 = vmatprep.mubr.f32.mxu0 %v3933_v19  ;;  %v1719_v18 = vld [vmem:[%s3917_s8 + $0x8] sm:$0xff]  ;;  %v1718_v20 = vld [vmem:[%s3917_s8] sm:$0xff] }
  0xb9   : > { %v1836_v21 = vld [vmem:[%s3920_s11 + $0x8] sm:$0xff]  ;;  %v1835_v22 = vld [vmem:[%s3920_s11] sm:$0xff] }
  0xba   : > { %2337 = vmatmul.mubr.msk.f32.gmra.mxu0 %vm1041_vm0, %v893_v34  ;;  %v1852_v23 = vsub.f32 1.0, %v1836_v21  ;;  %v1851_v24 = vsub.f32 1.0, %v1835_v22  ;;  %v1872_v25 = vld [vmem:[%s3918_s9 + $0x8] sm:$0xff]  ;;  %v1871_v26 = vld [vmem:[%s3918_s9] sm:$0xff] }
  0xbb   : > { %1319 = vperm.xlu1 %2534, %v1261_v35   ;;  %963 = vperm.xlu0 %2533, %v913_v36   ;;  %v1888_v27 = vld [vmem:[%s3919_s10 + $0x8] sm:$0xff]  ;;  %v1887_v28 = vld [vmem:[%s3919_s10] sm:$0xff] }
  0xbc   : > { %1184 = vmatprep.mubr.f32.mxu0 %v3933_v19 }
  0xbe   : > { %2338 = vmatmul.mubr.msk.f32.gmra.mxu0 %vm1041_vm0, %v894_v37 }
  0xbf   : > { %1314 = vperm.xlu1 %2534, %v1260_v38   ;;  %958 = vperm.xlu0 %2533, %v912_v39  }
  0xc0   : > { %1190 = vmatprep.mubr.f32.mxu0 %v3933_v19 }
  0xc2   : > { %2339 = vmatmul.mubr.msk.f32.gmra.mxu0 %vm1041_vm0, %v895_v40 }
  0xc3   : > { %1309 = vperm.xlu1 %2534, %v1259_v41   ;;  %953 = vperm.xlu0 %2533, %v911_v42  }
  0xc4   : > { %1196 = vmatprep.mubr.f32.mxu0 %v3933_v19 }
  0xc6   : > { %2340 = vmatmul.mubr.msk.f32.gmra.mxu0 %vm1041_vm0, %v896_v43 }
  0xc7   : > { %1304 = vperm.xlu1 %2534, %v1258_v44   ;;  %948 = vperm.xlu0 %2533, %v910_v45  }
  0xc8   : > { %1202 = vmatprep.mubr.f32.mxu0 %v3933_v19 }
  0xca   : > { %2341 = vmatmul.mubr.msk.f32.gmra.mxu0 %vm1041_vm0, %v897_v46 }
  0xcb   : > { %1299 = vperm.xlu1 %2534, %v1257_v47   ;;  %943 = vperm.xlu0 %2533, %v909_v48  }
  0xcc   : > { %1208 = vmatprep.mubr.f32.mxu0 %v3933_v19 }
  0xce   : > { %2342 = vmatmul.mubr.msk.f32.gmra.mxu0 %vm1041_vm0, %v898_v49 }
  0xcf   : > { %1294 = vperm.xlu1 %2534, %v1256_v50   ;;  %938 = vperm.xlu0 %2533, %v908_v51  }
  0xd0   : > { %1214 = vmatprep.mubr.f32.mxu0 %v3933_v19 }
  0xd2   : > { %2343 = vmatmul.mubr.msk.f32.gmra.mxu0 %vm1041_vm0, %v899_v52 }
  0xd3   : > { %1289 = vperm.xlu1 %2534, %v1255_v53   ;;  %933 = vperm.xlu0 %2533, %v907_v54  }
  0xd4   : > { %1220 = vmatprep.mubr.f32.mxu0 %v3933_v19 }
  0xd6   : > { %2344 = vmatmul.mubr.msk.f32.gmra.mxu0 %vm1041_vm0, %v900_v55 }
  0xd7   : > { %1284 = vperm.xlu1 %2534, %v1254_v56   ;;  %928 = vperm.xlu0 %2533, %v906_v57  }
  0xd8   : > { %1226 = vmatprep.mubr.f32.mxu0 %v3933_v19 }
  0xda   : > { %2345 = vmatmul.mubr.msk.f32.gmra.mxu0 %vm1041_vm0, %v901_v58 }
  0xdb   : > { %1279 = vperm.xlu1 %2534, %v1253_v59   ;;  %923 = vperm.xlu0 %2533, %v905_v60  }
  0xdc   : > { %1232 = vmatprep.mubr.f32.mxu0 %v3933_v19 }
  0xde   : > { %2346 = vmatmul.mubr.msk.f32.gmra.mxu0 %vm1041_vm0, %v902_v61 }
  0xdf   : > { %1269 = vperm.xlu1 %2534, %v1251_v62   ;;  %1274 = vperm.xlu0 %2533, %v1252_v63  }
  0xe0   : > { %1238 = vmatprep.mubr.f32.mxu0 %v3933_v19 }
  0xe2   : > { %2347 = vmatmul.mubr.msk.f32.gmra.mxu0 %vm1041_vm0, %v903_v0 }
  0xe3   : > { %1515 = vperm.xlu1 %2534, %v1441_v1   ;;  %1520 = vperm.xlu0 %2533, %v1442_v2  }
  0xe4   : > { %1244 = vmatprep.mubr.f32.mxu0 %v3933_v19 }
  0xe6   : > { %2348 = vmatmul.mubr.msk.f32.gmra.mxu0 %vm1041_vm0, %v904_v3 }
  0xe7   : > { %1505 = vperm.xlu1 %2534, %v1439_v4   ;;  %1510 = vperm.xlu0 %2533, %v1440_v5   ;;  %v3932_v4 = vlaneseq }
  0xe8   : > { %1794 = vmatprep.mubr.f32.mxu0 %v3933_v19 }
  0xeb   : > { %1495 = vperm.xlu1 %2534, %v1437_v6   ;;  %1500 = vperm.xlu0 %2533, %v1438_v7  }
  0xef   : > { %1485 = vperm.xlu1 %2534, %v1435_v8   ;;  %1490 = vperm.xlu0 %2533, %v1436_v9   ;;  %v3537_v8 = vshrl.u32 %v3932_v4, 7 }
  0xf1   : > { %3968 = vst [vmem:[#allocation16_spill] sm:$0xff] %v3537_v8 }
  0xf3   : > { %1475 = vperm.xlu1 %2534, %v1433_v10   ;;  %1480 = vperm.xlu0 %2533, %v1434_v11  }
  0xf7   : > { %1465 = vperm.xlu1 %2534, %v1431_v12   ;;  %1470 = vperm.xlu0 %2533, %v1432_v13   ;;  %v1003_v12 = vsub.s32 0, %v3537_v8  ;;  %v3548_v13 = vld [vmem:[%s3544_s26] sm:$0xff] }
  0xf8   : > { %3969 = vst [vmem:[#allocation17_spill] sm:$0xff] %v3548_v13 }
  0xfb   : > { %1455 = vperm.xlu1 %2534, %v1429_v14   ;;  %1460 = vperm.xlu0 %2533, %v1430_v15   ;;  %v3551_v14 = vld [vmem:[%s3544_s26 + $0x8] sm:$0xff] }
  0xfc   : > { %3970 = vst [vmem:[#allocation18_spill] sm:$0xff] %v3551_v14 }
  0xff   : > { %1445 = vperm.xlu1 %2534, %v1427_v16   ;;  %1450 = vperm.xlu0 %2533, %v1428_v17  }
 0x103   : > { %1727 = vperm.xlu1 %2534, %v1719_v18   ;;  %1722 = vperm.xlu0 %2533, %v1718_v20   ;;  %v3558_v20 = vrot.slane %v3548_v13, %v1003_v12 }
 0x107   : > { %1844 = vperm.xlu1 %2534, %v1836_v21   ;;  %1839 = vperm.xlu0 %2533, %v1835_v22   ;;  %v3561_v21 = vrot.slane %v3551_v14, %v1003_v12 }
 0x10b   : > { %1860 = vperm.xlu1 %2534, %v1852_v23   ;;  %1855 = vperm.xlu0 %2533, %v1851_v24  }
 0x10f   : > { %1880 = vperm.xlu1 %2534, %v1872_v25   ;;  %1875 = vperm.xlu0 %2533, %v1871_v26  }
 0x113   : > { %1896 = vperm.xlu1 %2534, %v1888_v27   ;;  %1891 = vperm.xlu0 %2533, %v1887_v28  }
 0x11e   : > { %v3455_v29 = vpop.permute.xlu0 %998  ;;  %v3459_v31 = vpop.permute.xlu1 %988 }
 0x11f   : > { %v1039_v23 = vmul.f32 %v3558_v20, %v3455_v29  ;;  %v1040_v28 = vmul.f32 %v3561_v21, %v3455_v29  ;;  %v1036_v4 = vmul.f32 %v3561_v21, %v3459_v31  ;;  %v1035_v8 = vmul.f32 %v3558_v20, %v3459_v31 }
 0x122   : > { %v994_v34 = vpop.permute.xlu0 %993  ;;  %v3467_v36 = vpop.permute.xlu1 %1344 }
 0x123   : > { %v1038_v24 = vmul.f32 %v3561_v21, %v994_v34  ;;  %v1037_v25 = vmul.f32 %v3558_v20, %v994_v34 }
 0x126   : > { %v3473_v39 = vpop.permute.xlu0 %983  ;;  %v3477_v41 = vpop.permute.xlu1 %1339 }
 0x127   : > { %v1034_v34 = vmul.f32 %v3561_v21, %v3473_v39  ;;  %v1033_v29 = vmul.f32 %v3558_v20, %v3473_v39 }
 0x12a   : > { %v3483_v44 = vpop.permute.xlu0 %978  ;;  %v3487_v46 = vpop.permute.xlu1 %1334 }
 0x12b   : > { %v1032_v31 = vmul.f32 %v3561_v21, %v3483_v44 }
 0x12e   : > { %v3493_v49 = vpop.permute.xlu0 %973  ;;  %v3497_v51 = vpop.permute.xlu1 %1329 }
 0x12f   : > { %v1030_v39 = vmul.f32 %v3561_v21, %v3493_v49 }
 0x132   : > { %v3503_v54 = vpop.permute.xlu0 %968  ;;  %v3507_v56 = vpop.permute.xlu1 %1324 }
 0x136   : > { %v3513_v59 = vpop.permute.xlu0 %963  ;;  %v3520_v61 = vpop.permute.xlu1 %1319 }
 0x13a   : > { %v3527_v0 = vpop.permute.xlu0 %958  ;;  %v3532_v2 = vpop.permute.xlu1 %1314 }
 0x13e   : > { %v3534_v6 = vpop.permute.xlu0 %953  ;;  %v3539_v9 = vpop.permute.xlu1 %1309 }
 0x142   : > { %v3553_v15 = vpop.permute.xlu0 %948  ;;  %v3555_v17 = vpop.permute.xlu1 %1304 }
 0x146   : > { %v3567_v26 = vpop.permute.xlu0 %943  ;;  %v3575_v14 = vpop.permute.xlu1 %1299 }
 0x16a   : > { %v3457_v30 = vpop.f32.mrf.mxu0 }
 0x16b   : > { %3964 = vst [vmem:[#allocation12_spill] sm:$0xff] %v3457_v30 }
 0x16c   : > { %v3461_v32 = vpop.f32.mrf.mxu0 }
 0x16d   : > { %3965 = vst [vmem:[#allocation13_spill] sm:$0xff] %v3461_v32 }
 0x16e   : > { %v3463_v33 = vpop.f32.mrf.mxu0 }
 0x16f   : > { %3966 = vst [vmem:[#allocation14_spill] sm:$0xff] %v3463_v33 }
 0x170   : > { %v3465_v35 = vpop.f32.mrf.mxu0 }
 0x171   : > { %3967 = vst [vmem:[#allocation15_spill] sm:$0xff] %v3465_v35  ;;  %v1031_v35 = vmul.f32 %v3558_v20, %v3483_v44 }
 0x172   : > { %v3469_v37 = vpop.f32.mrf.mxu0 }
 0x174   : > { %v3471_v38 = vpop.f32.mrf.mxu0 }
 0x176   : > { %v3475_v40 = vpop.f32.mrf.mxu0 }
 0x178   : > { %v3479_v42 = vpop.f32.mrf.mxu0 }
 0x17a   : > { %v3481_v43 = vpop.f32.mrf.mxu0 }
 0x17c   : > { %v3485_v45 = vpop.f32.mrf.mxu0 }
 0x17e   : > { %v3489_v47 = vpop.f32.mrf.mxu0 }
 0x180   : > { %v3491_v48 = vpop.f32.mrf.mxu0 }
 0x182   : > { %v3495_v50 = vpop.f32.mrf.mxu0 }
 0x184   : > { %v3499_v52 = vpop.f32.mrf.mxu0 }
 0x186   : > { %v3501_v53 = vpop.f32.mrf.mxu0 }
 0x188   : > { %v3505_v55 = vpop.f32.mrf.mxu0 }
 0x18a   : > { %v3509_v57 = vpop.f32.mrf.mxu0 }
 0x18c   : > { %v3511_v58 = vpop.f32.mrf.mxu0 }
 0x18e   : > { %v3515_v60 = vpop.f32.mrf.mxu0 }
 0x190   : > { %v3522_v62 = vpop.f32.mrf.mxu0 }
 0x192   : > { %v3525_v63 = vpop.f32.mrf.mxu0 }
 0x194   : > { %v3529_v1 = vpop.f32.mrf.mxu0 }
 0x196   : > { %v1222_v3 = vpop.f32.mrf.mxu0 }
 0x198   : > { %v1224_v5 = vpop.f32.mrf.mxu0 }
 0x199   : > { %v1225_v44 = vadd.f32 %v1224_v5, %v1032_v31 }
 0x19a   : > { %v1228_v7 = vpop.f32.mrf.mxu0 }
 0x19c   : > { %v1230_v10 = vpop.f32.mrf.mxu0 }
 0x19e   : > { %v1234_v11 = vpop.f32.mrf.mxu0 }
 0x1a0   : > { %v1236_v16 = vpop.f32.mrf.mxu0 }
 0x1a1   : > { %v1237_v32 = vadd.f32 %v1236_v16, %v1036_v4  ;;  %v3592_v4 = vpop.permute.xlu0 %938  ;;  %v1229_v16 = vadd.f32 %v1228_v7, %v1033_v29  ;;  %v1026_v7 = vmul.f32 %v3561_v21, %v3513_v59  ;;  %v1023_v29 = vmul.f32 %v3558_v20, %v3527_v0 }
 0x1a2   : > { %v1240_v18 = vpop.f32.mrf.mxu0 }
 0x1a3   : > { %v1241_v13 = vadd.f32 %v1240_v18, %v1037_v25  ;;  %v1207_v31 = vadd.f32 %v3511_v58, %v1026_v7  ;;  %v1015_v7 = vmul.f32 %v3558_v20, %v3592_v4 }
 0x1a4   : > { %v1242_v22 = vpop.f32.mrf.mxu0 }
 0x1a5   : > { %v1243_v19 = vadd.f32 %v1242_v22, %v1038_v24  ;;  %v1235_v22 = vadd.f32 %v1234_v11, %v1035_v8  ;;  %v1231_v24 = vadd.f32 %v1230_v10, %v1034_v34  ;;  %v1375_v8 = vadd.f32 %v3477_v41, %v1241_v13 }
 0x1a6   : > { %v1246_v27 = vpop.f32.mrf.mxu0  ;;  %v1027_v11 = vmul.f32 %v3558_v20, %v3503_v54  ;;  %v1374_v10 = vadd.f32 %v3487_v46, %v1237_v32  ;;  %v1025_v32 = vmul.f32 %v3558_v20, %v3513_v59 }
 0x1a7   : > { %v1247_v12 = vadd.f32 %v1246_v27, %v1039_v23  ;;  %v1376_v18 = vadd.f32 %v3477_v41, %v1243_v19  ;;  %v1223_v27 = vadd.f32 %v1222_v3, %v1031_v35  ;;  %v1219_v41 = vadd.f32 %v3529_v1, %v1030_v39 }
 0x1a8   : > { %v1248_v30 = vpop.f32.mrf.mxu0  ;;  %v1372_v13 = vadd.f32 %v3497_v51, %v1231_v24  ;;  %v1407_v35 = vmax.f32 %v1375_v8, 0.0  ;;  %v1370_v1 = vadd.f32 %v3507_v56, %v1225_v44  ;;  %v1406_v34 = vmax.f32 %v1374_v10, 0.0 }
 0x1a9   : > { %v1249_v33 = vadd.f32 %v1248_v30, %v1040_v28  ;;  %v1377_v23 = vadd.f32 %v3467_v36, %v1247_v12  ;;  %v1029_v30 = vmul.f32 %v3558_v20, %v3493_v49  ;;  %v1373_v49 = vadd.f32 %v3487_v46, %v1235_v22  ;;  %v934_v22 = vpop.permute.xlu0 %933 }
 0x1aa   : > { %v1408_v5 = vmax.f32 %v1376_v18, 0.0  ;;  %v1371_v12 = vadd.f32 %v3497_v51, %v1229_v16  ;;  %v1024_v46 = vmul.f32 %v3561_v21, %v3527_v0  ;;  %v1211_v59 = vadd.f32 %v3515_v60, %v1027_v11 }
 0x1ab   : > { %v1378_v25 = vadd.f32 %v3467_v36, %v1249_v33  ;;  %v1028_v33 = vmul.f32 %v3561_v21, %v3503_v54  ;;  %v3600_v36 = vpop.permute.xlu1 %1294  ;;  %v1409_v28 = vmax.f32 %v1377_v23, 0.0  ;;  %v1217_v54 = vadd.f32 %v3525_v63, %v1029_v30 }
 0x1ac   : > { %v1369_v63 = vadd.f32 %v3507_v56, %v1223_v27  ;;  %v1405_v51 = vmax.f32 %v1373_v49, 0.0  ;;  %v1022_v23 = vmul.f32 %v3561_v21, %v3534_v6  ;;  %v1404_v24 = vmax.f32 %v1372_v13, 0.0 }
 0x1ad   : > { %v1410_v19 = vmax.f32 %v1378_v25, 0.0  ;;  %v1213_v3 = vadd.f32 %v3522_v62, %v1028_v33  ;;  %v1368_v62 = vadd.f32 %v3520_v61, %v1219_v41  ;;  %v1021_v18 = vmul.f32 %v3558_v20, %v3534_v6  ;;  %v929_v33 = vpop.permute.xlu0 %928 }
 0x1ae   : > { %v1205_v60 = vadd.f32 %v3509_v57, %v1025_v32  ;;  %v1367_v56 = vadd.f32 %v3520_v61, %v1217_v54  ;;  %v1403_v25 = vmax.f32 %v1371_v12, 0.0  ;;  %v1020_v30 = vmul.f32 %v3561_v21, %v3553_v15 }
 0x1af   : > { %1523 = vmatprep.subr.mxu1 %v1410_v19  ;;  %v3625_v0 = vpop.permute.xlu1 %1289  ;;  %v1201_v58 = vadd.f32 %v3505_v55, %v1024_v46  ;;  %v1366_v39 = vadd.f32 %v3532_v2, %v1213_v3  ;;  %v1402_v16 = vmax.f32 %v1370_v1, 0.0  ;;  %v1019_v6 = vmul.f32 %v3558_v20, %v3553_v15 }
 0x1b0   : > { %1524 = vmatpush1.msra.mxu1 %v1409_v28  ;;  %v1199_v8 = vadd.f32 %v3501_v53, %v1023_v29  ;;  %v1365_v57 = vadd.f32 %v3532_v2, %v1211_v59  ;;  %v1401_v11 = vmax.f32 %v1369_v63, 0.0  ;;  %v1018_v61 = vmul.f32 %v3561_v21, %v3567_v26 }
 0x1b1   : > { %1525 = vmatprep.subr.mxu1 %v1408_v5  ;;  %v1195_v44 = vadd.f32 %v3499_v52, %v1022_v23  ;;  %v1364_v55 = vadd.f32 %v3539_v9, %v1207_v31  ;;  %v1400_v10 = vmax.f32 %v1368_v62, 0.0  ;;  %v1017_v19 = vmul.f32 %v3558_v20, %v3567_v26  ;;  %v924_v1 = vpop.permute.xlu0 %923 }
 0x1b2   : > { %1526 = vmatpush1.msra.mxu1 %v1407_v35  ;;  %v1193_v15 = vadd.f32 %v3495_v50, %v1021_v18  ;;  %v1363_v53 = vadd.f32 %v3539_v9, %v1205_v60  ;;  %v1399_v2 = vmax.f32 %v1367_v56, 0.0  ;;  %v1016_v27 = vmul.f32 %v3561_v21, %v3592_v4 }
 0x1b3   : > { %1527 = vmatprep.subr.mxu1 %v1406_v34  ;;  %v1189_v49 = vadd.f32 %v3491_v48, %v1020_v30  ;;  %v1362_v52 = vadd.f32 %v3555_v17, %v1201_v58  ;;  %v1398_v28 = vmax.f32 %v1366_v39, 0.0  ;;  %v1285_v26 = vpop.permute.xlu1 %1284  ;;  %v1187_v41 = vadd.f32 %v3489_v47, %v1019_v6  ;;  %v3974_v39 = vld [vmem:[#allocation12_spill] sm:$0xff] }
 0x1b4   : > { %1528 = vmatpush1.msra.mxu1 %v1405_v51  ;;  %v1361_v50 = vadd.f32 %v3555_v17, %v1199_v8  ;;  %v1397_v9 = vmax.f32 %v1365_v57, 0.0  ;;  %v1014_v13 = vmul.f32 %v3561_v21, %v934_v22  ;;  %v1183_v5 = vadd.f32 %v3485_v45, %v1018_v61 }
 0x1b5   : > { %1529 = vmatprep.subr.mxu1 %v1404_v24  ;;  %v1360_v48 = vadd.f32 %v3575_v14, %v1195_v44  ;;  %v1396_v32 = vmax.f32 %v1364_v55, 0.0  ;;  %v1013_v54 = vmul.f32 %v3558_v20, %v934_v22  ;;  %v1181_v12 = vadd.f32 %v3481_v43, %v1017_v19 }
 0x1b6   : > { %1530 = vmatpush1.msra.mxu1 %v1403_v25  ;;  %v1359_v4 = vadd.f32 %v3575_v14, %v1193_v15  ;;  %v1395_v35 = vmax.f32 %v1363_v53, 0.0  ;;  %v1012_v47 = vmul.f32 %v3561_v21, %v929_v33  ;;  %v1177_v17 = vadd.f32 %v3479_v42, %v1016_v27  ;;  %v3973_v25 = vld [vmem:[#allocation13_spill] sm:$0xff] }
 0x1b7   : > { %1531 = vmatprep.subr.mxu1 %v1402_v16  ;;  %v1358_v46 = vadd.f32 %v3600_v36, %v1189_v49  ;;  %v1394_v3 = vmax.f32 %v1362_v52, 0.0  ;;  %v1011_v45 = vmul.f32 %v3558_v20, %v929_v33  ;;  %v1175_v34 = vadd.f32 %v3475_v40, %v1015_v7  ;;  %v1280_v63 = vpop.permute.xlu1 %1279  ;;  %v1411_v49 = vld [vmem:[%s3975_s18] sm:$0xff]  ;;  %v1413_v7 = vld [vmem:[%s3975_s18 + $0x10] sm:$0xff] }
 0x1b8   : > { %1532 = vmatpush1.msra.mxu1 %v1401_v11  ;;  %v1357_v29 = vadd.f32 %v3600_v36, %v1187_v41  ;;  %v1393_v43 = vmax.f32 %v1361_v50, 0.0  ;;  %v1010_v14 = vmul.f32 %v3561_v21, %v924_v1  ;;  %v1171_v22 = vadd.f32 %v3471_v38, %v1014_v13  ;;  %v3971_v36 = vld [vmem:[#allocation15_spill] sm:$0xff]  ;;  %v3972_v21 = vld [vmem:[#allocation14_spill] sm:$0xff]  ;;  %v1416_v50 = vld [vmem:[%s3975_s18 + $0x28] sm:$0xff] }
 0x1b9   : > { %1533 = vmatprep.subr.mxu1 %v1400_v10  ;;  %v1356_v59 = vadd.f32 %v3625_v0, %v1183_v5  ;;  %v1392_v42 = vmax.f32 %v1360_v48, 0.0  ;;  %v1009_v51 = vmul.f32 %v3558_v20, %v924_v1  ;;  %v1169_v23 = vadd.f32 %v3469_v37, %v1013_v54  ;;  %v1275_v37 = vpop.permute.xlu0 %1274  ;;  %v1415_v41 = vld [vmem:[%s3975_s18 + $0x20] sm:$0xff]  ;;  %v1418_v13 = vld [vmem:[%s3975_s18 + $0x38] sm:$0xff]  ;;  %v1420_v48 = vld [vmem:[%s3975_s18 + $0x48] sm:$0xff] }
 0x1ba   : > { %1534 = vmatpush1.msra.mxu1 %v1399_v2  ;;  %v1355_v31 = vadd.f32 %v3625_v0, %v1181_v12  ;;  %v1391_v40 = vmax.f32 %v1359_v4, 0.0  ;;  %v1165_v62 = vadd.f32 %v3971_v36, %v1012_v47  ;;  %v1354_v24 = vadd.f32 %v1285_v26, %v1177_v17  ;;  %v1419_v5 = vld [vmem:[%s3975_s18 + $0x40] sm:$0xff]  ;;  %v1422_v54 = vld [vmem:[%s3975_s18 + $0x58] sm:$0xff]  ;;  %v1424_v4 = vld [vmem:[%s3975_s18 + $0x68] sm:$0xff] }
 0x1bb   : > { %1535 = vmatprep.subr.mxu1 %v1398_v28  ;;  %v1390_v18 = vmax.f32 %v1358_v46, 0.0  ;;  %v1163_v38 = vadd.f32 %v3972_v21, %v1011_v45  ;;  %v1353_v60 = vadd.f32 %v1285_v26, %v1175_v34  ;;  %v1389_v56 = vmax.f32 %v1357_v29, 0.0  ;;  %v1270_v11 = vpop.permute.xlu1 %1269  ;;  %v1412_v28 = vld [vmem:[%s3975_s18 + $0x8] sm:$0xff]  ;;  %v1414_v26 = vld [vmem:[%s3975_s18 + $0x18] sm:$0xff]  ;;  %v1423_v12 = vld [vmem:[%s3975_s18 + $0x60] sm:$0xff] }
 0x1bc   : > { %1536 = vmatpush1.msra.mxu1 %v1397_v9  ;;  %v1159_v30 = vadd.f32 %v3973_v25, %v1010_v14  ;;  %v1352_v58 = vadd.f32 %v1280_v63, %v1171_v22  ;;  %v1388_v20 = vmax.f32 %v1356_v59, 0.0  ;;  %v1157_v0 = vadd.f32 %v3974_v39, %v1009_v51  ;;  %v1417_v9 = vld [vmem:[%s3975_s18 + $0x30] sm:$0xff]  ;;  %v1426_v47 = vld [vmem:[%s3975_s18 + $0x78] sm:$0xff] }
 0x1bd   : > { %1537 = vmatprep.subr.mxu1 %v1396_v32  ;;  %v1351_v16 = vadd.f32 %v1280_v63, %v1169_v23  ;;  %v1387_v6 = vmax.f32 %v1355_v31, 0.0  ;;  %v1350_v8 = vadd.f32 %v1275_v37, %v1165_v62  ;;  %v1386_v57 = vmax.f32 %v1354_v24, 0.0  ;;  %v1421_v32 = vld [vmem:[%s3975_s18 + $0x50] sm:$0xff] }
 0x1be   : > { %1538 = vmatpush1.msra.mxu1 %v1395_v35  ;;  %v1349_v61 = vadd.f32 %v1275_v37, %v1163_v38  ;;  %v1385_v44 = vmax.f32 %v1353_v60, 0.0  ;;  %v1348_v55 = vadd.f32 %v1270_v11, %v1159_v30  ;;  %v1384_v10 = vmax.f32 %v1352_v58, 0.0  ;;  %v1425_v35 = vld [vmem:[%s3975_s18 + $0x70] sm:$0xff]  ;;  %v1521_v60 = vpop.permute.xlu0 %1520 }
 0x1bf   : > { %1539 = vmatprep.subr.mxu1 %v1394_v3  ;;  %v1347_v19 = vadd.f32 %v1270_v11, %v1157_v0  ;;  %v1383_v33 = vmax.f32 %v1351_v16, 0.0  ;;  %v1382_v15 = vmax.f32 %v1350_v8, 0.0  ;;  %v3976_v52 = vmov 0.0   ;;  %v1516_v25 = vpop.permute.xlu1 %1515 }
 0x1c0   : > { %1540 = vmatpush1.msra.mxu1 %v1393_v43  ;;  %v1381_v53 = vmax.f32 %v1349_v61, 0.0  ;;  %v1380_v2 = vmax.f32 %v1348_v55, 0.0 }
 0x1c1   : > { %1541 = vmatprep.subr.mxu1 %v1392_v42  ;;  %v1379_v27 = vmax.f32 %v1347_v19, 0.0 }
 0x1c2   : > { %1542 = vmatpush1.msra.mxu1 %v1391_v40 }
 0x1c3   : > { %1543 = vmatprep.subr.mxu1 %v1390_v18  ;;  %v1506_v39 = vpop.permute.xlu1 %1505 }
 0x1c4   : > { %1544 = vmatpush1.msra.mxu1 %v1389_v56 }
 0x1c5   : > { %1545 = vmatprep.subr.mxu1 %v1388_v20  ;;  %v1511_v20 = vpop.permute.xlu0 %1510 }
 0x1c6   : > { %1546 = vmatpush1.msra.mxu1 %v1387_v6 }
 0x1c7   : > { %1547 = vmatprep.subr.mxu1 %v1386_v57  ;;  %v1496_v57 = vpop.permute.xlu1 %1495 }
 0x1c8   : > { %1548 = vmatpush1.msra.mxu1 %v1385_v44 }
 0x1c9   : > { %1549 = vmatprep.subr.mxu1 %v1384_v10  ;;  %v1501_v6 = vpop.permute.xlu0 %1500 }
 0x1ca   : > { %1550 = vmatpush1.msra.mxu1 %v1383_v33 }
 0x1cb   : > { %1551 = vmatprep.subr.mxu1 %v1382_v15 }
 0x1cc   : > { %1552 = vmatpush1.msra.mxu1 %v1381_v53 }
 0x1cd   : > { %1553 = vmatprep.subr.mxu1 %v1380_v2  ;;  %v1491_v19 = vpop.permute.xlu0 %1490  ;;  %v1486_v2 = vpop.permute.xlu1 %1485 }
 0x1ce   : > { %1554 = vmatpush1.msra.mxu1 %v1379_v27 }
 0x1cf   : > { %1588 = vmatmul.mubr.f32.vlgmr.msra.gmra.mxu1 %v1411_v49 }
 0x1d0   : > { %1593 = vmatprep.mubr.f32.mxu1 %v3976_v52 }
 0x1d3   : > { %1594 = vmatmul.mubr.f32.gmra.mxu1 %v1412_v28 }
 0x1d4   : > { %1599 = vmatprep.mubr.f32.mxu1 %v3976_v52 }
 0x1d7   : > { %1600 = vmatmul.mubr.f32.gmra.mxu1 %v1413_v7 }
 0x1d8   : > { %1605 = vmatprep.mubr.f32.mxu1 %v3976_v52 }
 0x1db   : > { %1606 = vmatmul.mubr.f32.gmra.mxu1 %v1414_v26 }
 0x1dc   : > { %1611 = vmatprep.mubr.f32.mxu1 %v3976_v52 }
 0x1df   : > { %1612 = vmatmul.mubr.f32.gmra.mxu1 %v1415_v41 }
 0x1e0   : > { %1617 = vmatprep.mubr.f32.mxu1 %v3976_v52 }
 0x1e3   : > { %1618 = vmatmul.mubr.f32.gmra.mxu1 %v1416_v50 }
 0x1e4   : > { %1623 = vmatprep.mubr.f32.mxu1 %v3976_v52 }
 0x1e7   : > { %1624 = vmatmul.mubr.f32.gmra.mxu1 %v1417_v9 }
 0x1e8   : > { %1629 = vmatprep.mubr.f32.mxu1 %v3976_v52 }
 0x1eb   : > { %1630 = vmatmul.mubr.f32.gmra.mxu1 %v1418_v13  ;;  %v1481_v13 = vpop.permute.xlu0 %1480 }
 0x1ec   : > { %1635 = vmatprep.mubr.f32.mxu1 %v3976_v52 }
 0x1ef   : > { %1636 = vmatmul.mubr.f32.gmra.mxu1 %v1419_v5 }
 0x1f0   : > { %1641 = vmatprep.mubr.f32.mxu1 %v3976_v52 }
 0x1f3   : > { %1642 = vmatmul.mubr.f32.gmra.mxu1 %v1420_v48 }
 0x1f4   : > { %1647 = vmatprep.mubr.f32.mxu1 %v3976_v52 }
 0x1f7   : > { %1648 = vmatmul.mubr.f32.gmra.mxu1 %v1421_v32 }
 0x1f8   : > { %1653 = vmatprep.mubr.f32.mxu1 %v3976_v52 }
 0x1fb   : > { %1654 = vmatmul.mubr.f32.gmra.mxu1 %v1422_v54 }
 0x1fc   : > { %1659 = vmatprep.mubr.f32.mxu1 %v3976_v52 }
 0x1ff   : > { %1660 = vmatmul.mubr.f32.gmra.mxu1 %v1423_v12  ;;  %v1476_v12 = vpop.permute.xlu1 %1475 }
 0x200   : > { %1665 = vmatprep.mubr.f32.mxu1 %v3976_v52 }
 0x203   : > { %1666 = vmatmul.mubr.f32.gmra.mxu1 %v1424_v4 }
 0x204   : > { %1671 = vmatprep.mubr.f32.mxu1 %v3976_v52 }
 0x207   : > { %1672 = vmatmul.mubr.f32.gmra.mxu1 %v1425_v35 }
 0x208   : > { %1677 = vmatprep.mubr.f32.mxu1 %v3976_v52 }
 0x20b   : > { %1678 = vmatmul.mubr.f32.gmra.mxu1 %v1426_v47 }
 0x28f   : > { %v3738_v17 = vpop.f32.mrf.mxu1 }
 0x291   : > { %v3740_v46 = vpop.f32.mrf.mxu1 }
 0x293   : > { %v3742_v3 = vpop.f32.mrf.mxu1 }
 0x295   : > { %v3744_v45 = vpop.f32.mrf.mxu1 }
 0x297   : > { %v3746_v1 = vpop.f32.mrf.mxu1 }
 0x299   : > { %v3748_v34 = vpop.f32.mrf.mxu1 }
 0x29b   : > { %v3750_v29 = vpop.f32.mrf.mxu1 }
 0x29d   : > { %v3752_v43 = vpop.f32.mrf.mxu1 }
 0x29f   : > { %v3754_v14 = vpop.f32.mrf.mxu1 }
 0x2a1   : > { %v3756_v22 = vpop.f32.mrf.mxu1 }
 0x2a3   : > { %v3758_v59 = vpop.f32.mrf.mxu1 }
 0x2a5   : > { %v3760_v42 = vpop.f32.mrf.mxu1 }
 0x2a7   : > { %v3762_v63 = vpop.f32.mrf.mxu1 }
 0x2a9   : > { %v3764_v51 = vpop.f32.mrf.mxu1 }
 0x2ab   : > { %v3766_v23 = vpop.f32.mrf.mxu1 }
 0x2ad   : > { %v3768_v31 = vpop.f32.mrf.mxu1 }
 0x2af   : > { %v1637_v40 = vpop.f32.mrf.mxu1 }
 0x2b1   : > { %v1639_v36 = vpop.f32.mrf.mxu1 }
 0x2b3   : > { %v1643_v62 = vpop.f32.mrf.mxu1 }
 0x2b5   : > { %v1645_v24 = vpop.f32.mrf.mxu1 }
 0x2b6   : > { %v1646_v47 = vadd.f32 %v1645_v24, %v1491_v19 }
 0x2b7   : > { %v1649_v18 = vpop.f32.mrf.mxu1 }
 0x2b8   : > { %v1650_v4 = vadd.f32 %v1649_v18, %v1496_v57  ;;  %v1466_v18 = vpop.permute.xlu1 %1465 }
 0x2b9   : > { %v1651_v21 = vpop.f32.mrf.mxu1 }
 0x2ba   : > { %v1652_v32 = vadd.f32 %v1651_v21, %v1496_v57  ;;  %v1634_v21 = vadd.f32 %v3768_v31, %v1481_v13 }
 0x2bb   : > { %v1655_v38 = vpop.f32.mrf.mxu1 }
 0x2bc   : > { %v1656_v5 = vadd.f32 %v1655_v38, %v1501_v6  ;;  %v1638_v38 = vadd.f32 %v1637_v40, %v1486_v2 }
 0x2bd   : > { %v1657_v56 = vpop.f32.mrf.mxu1 }
 0x2be   : > { %v1658_v50 = vadd.f32 %v1657_v56, %v1501_v6  ;;  %v1640_v56 = vadd.f32 %v1639_v36, %v1486_v2  ;;  %v1626_v36 = vadd.f32 %v3762_v63, %v1476_v12  ;;  %v1700_v6 = vmax.f32 %v1638_v38, 0.0 }
 0x2bf   : > { %v1661_v30 = vpop.f32.mrf.mxu1 }
 0x2c0   : > { %v1662_v26 = vadd.f32 %v1661_v30, %v1506_v39  ;;  %v1706_v30 = vmax.f32 %v1656_v5, 0.0 }
 0x2c1   : > { %v1663_v58 = vpop.f32.mrf.mxu1 }
 0x2c2   : > { %v1664_v28 = vadd.f32 %v1663_v58, %v1506_v39  ;;  %v1708_v35 = vmax.f32 %v1662_v26, 0.0  ;;  %v1705_v58 = vmax.f32 %v1652_v32, 0.0  ;;  %v1703_v39 = vmax.f32 %v1646_v47, 0.0 }
 0x2c3   : > { %v1667_v37 = vpop.f32.mrf.mxu1 }
 0x2c4   : > { %v1668_v27 = vadd.f32 %v1667_v37, %v1511_v20  ;;  %v1709_v54 = vmax.f32 %v1664_v28, 0.0  ;;  %v1704_v37 = vmax.f32 %v1650_v4, 0.0 }
 0x2c5   : > { %v1669_v0 = vpop.f32.mrf.mxu1 }
 0x2c6   : > { %v1670_v15 = vadd.f32 %v1669_v0, %v1511_v20  ;;  %v1710_v48 = vmax.f32 %v1668_v27, 0.0  ;;  %v1471_v20 = vpop.permute.xlu0 %1470  ;;  %v1632_v0 = vadd.f32 %v3766_v23, %v1481_v13  ;;  %v1616_v23 = vadd.f32 %v3756_v22, %v1466_v18 }
 0x2c7   : > { %v1673_v16 = vpop.f32.mrf.mxu1  ;;  %v1622_v40 = vadd.f32 %v3760_v42, %v1471_v20  ;;  %v1620_v57 = vadd.f32 %v3758_v59, %v1471_v20 }
 0x2c8   : > { %v1674_v33 = vadd.f32 %v1673_v16, %v1516_v25  ;;  %v1711_v9 = vmax.f32 %v1670_v15, 0.0  ;;  %v1701_v16 = vmax.f32 %v1640_v56, 0.0 }
 0x2c9   : > { %v1675_v8 = vpop.f32.mrf.mxu1 }
 0x2ca   : > { %v1676_v55 = vadd.f32 %v1675_v8, %v1516_v25  ;;  %v1712_v41 = vmax.f32 %v1674_v33, 0.0  ;;  %v1644_v25 = vadd.f32 %v1643_v62, %v1491_v19  ;;  %v1628_v62 = vadd.f32 %v3764_v51, %v1476_v12  ;;  %v1461_v31 = vpop.permute.xlu0 %1460  ;;  %v1456_v51 = vpop.permute.xlu1 %1455 }
 0x2cb   : > { %v1679_v11 = vpop.f32.mrf.mxu1  ;;  %v1699_v8 = vmax.f32 %v1634_v21, 0.0  ;;  %v1610_v63 = vadd.f32 %v3752_v43, %v1461_v31  ;;  %v1608_v42 = vadd.f32 %v3750_v29, %v1461_v31  ;;  %v1694_v19 = vmax.f32 %v1620_v57, 0.0 }
 0x2cc   : > { %v1680_v61 = vadd.f32 %v1679_v11, %v1521_v60  ;;  %v1713_v7 = vmax.f32 %v1676_v55, 0.0  ;;  %v1702_v24 = vmax.f32 %v1644_v25, 0.0  ;;  %v1698_v11 = vmax.f32 %v1632_v0, 0.0 }
 0x2cd   : > { %v1681_v44 = vpop.f32.mrf.mxu1  ;;  %v1696_v55 = vmax.f32 %v1626_v36, 0.0  ;;  %v1604_v59 = vadd.f32 %v3748_v34, %v1456_v51  ;;  %v1693_v33 = vmax.f32 %v1616_v23, 0.0  ;;  %v1602_v15 = vadd.f32 %v3746_v1, %v1456_v51 }
 0x2ce   : > { %v1682_v10 = vadd.f32 %v1681_v44, %v1521_v60  ;;  %v1714_v49 = vmax.f32 %v1680_v61, 0.0  ;;  %v1707_v60 = vmax.f32 %v1658_v50, 0.0  ;;  %v1697_v61 = vmax.f32 %v1628_v62, 0.0  ;;  %v1451_v22 = vpop.permute.xlu0 %1450  ;;  %v1446_v43 = vpop.permute.xlu1 %1445 }
 0x2cf   : > { %v1614_v44 = vadd.f32 %v3754_v14, %v1466_v18  ;;  %v1598_v14 = vadd.f32 %v3744_v45, %v1451_v22  ;;  %v1691_v2 = vmax.f32 %v1610_v63, 0.0  ;;  %v1596_v27 = vadd.f32 %v3742_v3, %v1451_v22  ;;  %v1716_v3 = vld [vmem:[%s3977_s14] sm:$0xff] }
 0x2d0   : > { %v1715_v53 = vmax.f32 %v1682_v10, 0.0  ;;  %v1695_v10 = vmax.f32 %v1622_v40, 0.0  ;;  %v1592_v29 = vadd.f32 %v3740_v46, %v1446_v43  ;;  %v1689_v28 = vmax.f32 %v1604_v59, 0.0 }
 0x2d1   : > { %v1590_v34 = vadd.f32 %v3738_v17, %v1446_v43  ;;  %v1687_v1 = vmax.f32 %v1598_v14, 0.0  ;;  %v1686_v26 = vmax.f32 %v1596_v27, 0.0  ;;  %v1717_v17 = vld [vmem:[%s3977_s14 + $0x8] sm:$0xff] }
 0x2d2   : > { %1730 = vmatprep.subr.mxu0 %v1715_v53  ;;  %v1692_v53 = vmax.f32 %v1614_v44, 0.0  ;;  %v1685_v45 = vmax.f32 %v1592_v29, 0.0  ;;  %v1723_v46 = vpop.permute.xlu0 %1722  ;;  %v1728_v32 = vpop.permute.xlu1 %1727  ;;  %v3978_v27 = vld [vmem:[#allocation17_spill] sm:$0xff] }
 0x2d3   : > { %1731 = vmatpush1.msra.mxu0 %v1714_v49  ;;  %v1690_v49 = vmax.f32 %v1608_v42, 0.0 }
 0x2d4   : > { %1732 = vmatprep.subr.mxu0 %v1713_v7  ;;  %v1688_v7 = vmax.f32 %v1602_v15, 0.0 }
 0x2d5   : > { %1733 = vmatpush1.msra.mxu0 %v1712_v41  ;;  %v1684_v41 = vmax.f32 %v1590_v34, 0.0 }
 0x2d6   : > { %1734 = vmatprep.subr.mxu0 %v1711_v9  ;;  %v1840_v18 = vpop.permute.xlu0 %1839 }
 0x2d7   : > { %1735 = vmatpush1.msra.mxu0 %v1710_v48 }
 0x2d8   : > { %1736 = vmatprep.subr.mxu0 %v1709_v54 }
 0x2d9   : > { %1737 = vmatpush1.msra.mxu0 %v1708_v35 }
 0x2da   : > { %1738 = vmatprep.subr.mxu0 %v1707_v60  ;;  %v1856_v36 = vpop.permute.xlu0 %1855 }
 0x2db   : > { %1739 = vmatpush1.msra.mxu0 %v1706_v30 }
 0x2dc   : > { %1740 = vmatprep.subr.mxu0 %v1705_v58 }
 0x2dd   : > { %1741 = vmatpush1.msra.mxu0 %v1704_v37 }
 0x2de   : > { %1742 = vmatprep.subr.mxu0 %v1703_v39  ;;  %v1876_v57 = vpop.permute.xlu0 %1875 }
 0x2df   : > { %1743 = vmatpush1.msra.mxu0 %v1702_v24 }
 0x2e0   : > { %1744 = vmatprep.subr.mxu0 %v1701_v16  ;;  %v1845_v16 = vpop.permute.xlu1 %1844 }
 0x2e1   : > { %1745 = vmatpush1.msra.mxu0 %v1700_v6 }
 0x2e2   : > { %1746 = vmatprep.subr.mxu0 %v1699_v8 }
 0x2e3   : > { %1747 = vmatpush1.msra.mxu0 %v1698_v11 }
 0x2e4   : > { %1748 = vmatprep.subr.mxu0 %v1697_v61  ;;  %v1861_v40 = vpop.permute.xlu1 %1860 }
 0x2e5   : > { %1749 = vmatpush1.msra.mxu0 %v1696_v55 }
 0x2e6   : > { %1750 = vmatprep.subr.mxu0 %v1695_v10 }
 0x2e7   : > { %1751 = vmatpush1.msra.mxu0 %v1694_v19 }
 0x2e8   : > { %1752 = vmatprep.subr.mxu0 %v1693_v33  ;;  %v1881_v42 = vpop.permute.xlu1 %1880 }
 0x2e9   : > { %1753 = vmatpush1.msra.mxu0 %v1692_v53  ;;  %v1892_v53 = vpop.permute.xlu0 %1891 }
 0x2ea   : > { %1754 = vmatprep.subr.mxu0 %v1691_v2 }
 0x2eb   : > { %1755 = vmatpush1.msra.mxu0 %v1690_v49  ;;  %v2013_v49 = vrot.slane %v3978_v27, 5 }
 0x2ec   : > { %1756 = vmatprep.subr.mxu0 %v1689_v28 }
 0x2ed   : > { %1757 = vmatpush1.msra.mxu0 %v1688_v7 }
 0x2ee   : > { %1758 = vmatprep.subr.mxu0 %v1687_v1  ;;  %v1897_v1 = vpop.permute.xlu1 %1896 }
 0x2ef   : > { %1759 = vmatpush1.msra.mxu0 %v1686_v26 }
 0x2f0   : > { %1760 = vmatprep.subr.mxu0 %v1685_v45 }
 0x2f1   : > { %1761 = vmatpush1.msra.mxu0 %v1684_v41 }
 0x2f2   : > { %1795 = vmatmul.mubr.f32.vlgmr.msra.gmra.mxu0 %v1716_v3 }
 0x2f3   : > { %1800 = vmatprep.mubr.f32.mxu0 %v3976_v52 }
 0x2f6   : > { %1801 = vmatmul.mubr.f32.gmra.mxu0 %v1717_v17 }
 0x3b2   : > { %v1796_v50 = vpop.f32.mrf.mxu0 }
 0x3b3   : > { %v1797_v9 = vadd.f32 %v1796_v50, %v1723_v46 }
 0x3b4   : > { %v1798_v13 = vpop.f32.mrf.mxu0 }
 0x3b5   : > { %v1807_v5 = vsub.f32 0.0, %v1797_v9  ;;  %v1799_v48 = vadd.f32 %v1798_v13, %v1723_v46 }
 0x3b6   : > { %v1802_v54 = vpop.f32.mrf.mxu0 }
 0x3b7   : > { %v1811_v12 = vmul.f32 1.442695, %v1807_v5  ;;  %v1808_v4 = vsub.f32 0.0, %v1799_v48  ;;  %v1803_v35 = vadd.f32 %v1802_v54, %v1728_v32 }
 0x3b8   : > { %v1804_v47 = vpop.f32.mrf.mxu0 }
 0x3b9   : > { %2535 = vpow2.f32 %v1811_v12  ;;  %v1813_v60 = vmul.f32 1.442695, %v1808_v4  ;;  %v1809_v52 = vsub.f32 0.0, %v1803_v35  ;;  %v1805_v25 = vadd.f32 %v1804_v47, %v1728_v32 }
 0x3bb   : > { %2537 = vpow2.f32 %v1813_v60  ;;  %v1815_v30 = vmul.f32 1.442695, %v1809_v52  ;;  %v1810_v56 = vsub.f32 0.0, %v1805_v25 }
 0x3bd   : > { %2539 = vpow2.f32 %v1815_v30  ;;  %v1817_v58 = vmul.f32 1.442695, %v1810_v56  ;;  %v3979_v30 = vld [vmem:[#allocation18_spill] sm:$0xff] }
 0x3bf   : > { %2541 = vpow2.f32 %v1817_v58 }
 0x3c0   : > { %2543 = vtanh.f32 %v1797_v9 }
 0x3c1   : > { %2545 = vtanh.f32 %v1799_v48 }
 0x3c6   : > { %v2536_v20 = vpop.eup %2535 }
 0x3c7   : > { %v1819_v38 = vadd.f32 1.0, %v2536_v20 }
 0x3c8   : > { %v2538_v37 = vpop.eup %2537 }
 0x3c9   : > { %2547 = vrcp.f32 %v1819_v38  ;;  %v1820_v21 = vadd.f32 1.0, %v2538_v37  ;;  %v2014_v38 = vrot.slane %v3979_v30, 5 }
 0x3ca   : > { %v2540_v39 = vpop.eup %2539  ;;  %2549 = vtanh.f32 %v1803_v35 }
 0x3cb   : > { %2551 = vrcp.f32 %v1820_v21  ;;  %v1821_v0 = vadd.f32 1.0, %v2540_v39 }
 0x3cc   : > { %v2542_v24 = vpop.eup %2541 }
 0x3cd   : > { %2553 = vrcp.f32 %v1821_v0  ;;  %v1822_v62 = vadd.f32 1.0, %v2542_v24  ;;  %v2544_v6 = vpop.eup %2543 }
 0x3ce   : > { %v2546_v8 = vpop.eup %2545  ;;  %v1863_v61 = vmul.f32 %v2544_v6, %v1856_v36 }
 0x3cf   : > { %2555 = vrcp.f32 %v1822_v62  ;;  %v1864_v63 = vmul.f32 %v2546_v8, %v1856_v36 }
 0x3d0   : > { %2557 = vtanh.f32 %v1805_v25 }
 0x3d6   : > { %v2548_v31 = vpop.eup %2547 }
 0x3d7   : > { %v2550_v11 = vpop.eup %2549  ;;  %v1847_v23 = vmul.f32 %v2548_v31, %v1840_v18 }
 0x3d8   : > { %v2552_v51 = vpop.eup %2551  ;;  %v1865_v22 = vmul.f32 %v2550_v11, %v1861_v40 }
 0x3d9   : > { %v1867_v44 = vadd.f32 %v1863_v61, %v1847_v23  ;;  %v1848_v55 = vmul.f32 %v2552_v51, %v1840_v18 }
 0x3da   : > { %v2554_v10 = vpop.eup %2553 }
 0x3db   : > { %v1883_v19 = vmul.f32 %v1876_v57, %v1867_v44  ;;  %v1868_v59 = vadd.f32 %v1864_v63, %v1848_v55  ;;  %v1849_v33 = vmul.f32 %v2554_v10, %v1845_v16 }
 0x3dc   : > { %v2556_v15 = vpop.eup %2555 }
 0x3dd   : > { %v2558_v14 = vpop.eup %2557  ;;  %v3793_v2 = vadd.f32 %v1892_v53, %v1883_v19  ;;  %v1869_v43 = vadd.f32 %v1865_v22, %v1849_v33  ;;  %v1884_v29 = vmul.f32 %v1876_v57, %v1868_v59  ;;  %v1850_v28 = vmul.f32 %v2556_v15, %v1845_v16 }
 0x3de   : > { %v1866_v45 = vmul.f32 %v2558_v14, %v1861_v40 }
 0x3df   : > { %v1885_v34 = vmul.f32 %v1881_v42, %v1869_v43  ;;  %v1905_v7 = vrot.slane %v3793_v2, 4  ;;  %v1989_v26 = vrot.slane %v3793_v2, 3  ;;  %v2017_v3 = vsub.f32 %v3793_v2, %v2013_v49 }
 0x3e0   : > { %v3801_v17 = vadd.f32 %v1892_v53, %v1884_v29  ;;  %v1870_v9 = vadd.f32 %v1866_v45, %v1850_v28  ;;  %v1987_v48 = vsub.f32 0.0, %v3793_v2 }
 0x3e1   : > { %v3798_v41 = vadd.f32 %v1897_v1, %v1885_v34  ;;  %v1909_v46 = vsub.f32 %v3978_v27, %v1905_v7  ;;  %v1993_v50 = vsub.f32 %v3978_v27, %v1989_v26  ;;  %v2021_v13 = vrot.slane %v2017_v3, 1 }
 0x3e2   : > { %v1886_v35 = vmul.f32 %v1881_v42, %v1870_v9  ;;  %v1906_v47 = vrot.slane %v3801_v17, 4  ;;  %v1990_v24 = vrot.slane %v3801_v17, 3  ;;  %v2018_v62 = vsub.f32 %v3801_v17, %v2014_v38 }
 0x3e3   : > { %v2057_v5 = vrot.slane %v3798_v41, 7  ;;  %v1997_v32 = vrot.slane %v1993_v50, 6  ;;  %v1921_v12 = vrot.slane %v1909_v46, 5  ;;  %v2025_v60 = vmul.f32 %v2021_v13, %v1987_v48 }
 0x3e4   : > { %v1910_v56 = vsub.f32 %v3979_v30, %v1906_v47  ;;  %v3818_v20 = vadd.f32 %v1897_v1, %v1886_v35  ;;  %v1994_v6 = vsub.f32 %v3979_v30, %v1990_v24  ;;  %v1988_v40 = vsub.f32 0.0, %v3801_v17 }
 0x3e5   : > { %v2061_v54 = vsub.f32 %v3978_v27, %v2057_v5  ;;  %v2001_v4 = vmul.f32 %v1997_v32, %v1987_v48  ;;  %v1925_v37 = vadd.f32 %v1921_v12, %v3793_v2  ;;  %v2027_v39 = vmul.f32 1.442695, %v2025_v60  ;;  %v2591_v60 = vld [vmem:[%s3544_s26] sm:$0xff] }
 0x3e6   : > { %v1922_v21 = vrot.slane %v1910_v56, 5  ;;  %v2058_v16 = vrot.slane %v3818_v20, 7  ;;  %v2022_v8 = vrot.slane %v2018_v62, 1  ;;  %v1998_v11 = vrot.slane %v1994_v6, 6 }
 0x3e7   : > { %v3812_v52 = vmul.f32 %v2061_v54, %v3798_v41  ;;  %v2003_v25 = vmul.f32 1.442695, %v2001_v4  ;;  %v1929_v36 = vrot.slane %v1925_v37, 1  ;;  %v1913_v19 = vrot.slane %v1909_v46, 6 }
 0x3e8   : > { %v1926_v0 = vadd.f32 %v1922_v21, %v3801_v17  ;;  %v2062_v31 = vsub.f32 %v3979_v30, %v2058_v16  ;;  %v2026_v23 = vmul.f32 %v2022_v8, %v1988_v40  ;;  %v2002_v51 = vmul.f32 %v1998_v11, %v1988_v40  ;;  %v2592_v30 = vld [vmem:[%s3544_s26 + $0x8] sm:$0xff]  ;;  %s2330_s26 = sshll.u32 %s3208_s27, 1 }
 0x3e9   : > { %v2075_v58 = vsub.f32 0.0, %v3812_v52  ;;  %2559 = vpow2.f32 %v2003_v25  ;;  %v1914_v33 = vrot.slane %v1910_v56, 6  ;;  %v1917_v53 = vmul.f32 %v1913_v19, %v3793_v2  ;;  %s858_s5 = scalar_lea.vmem [#allocation3], %s2330_s26 }
 0x3ea   : > { %v1930_v57 = vrot.slane %v1926_v0, 1  ;;  %v3830_v61 = vmul.f32 %v2062_v31, %v3818_v20  ;;  %v2029_v44 = vmul.f32 1.442695, %v2026_v23  ;;  %v2005_v63 = vmul.f32 1.442695, %v2002_v51 }
 0x3eb   : > { %v2077_v18 = vmul.f32 1.442695, %v2075_v58  ;;  %v1918_v43 = vmul.f32 %v1914_v33, %v3801_v17  ;;  %v1919_v28 = vsub.f32 0.0, %v1917_v53  ;;  %v1961_v34 = vrot.slane %v3793_v2, 1 }
 0x3ec   : > { %v2076_v55 = vsub.f32 0.0, %v3830_v61  ;;  %v1962_v45 = vrot.slane %v3801_v17, 1  ;;  %v1947_v25 = vrot.slane %v2591_v60, 1  ;;  %v1948_v56 = vrot.slane %v2592_v30, 1 }
 0x3ed   : > { %2561 = vpow2.f32 %v2077_v18  ;;  %v1920_v26 = vsub.f32 0.0, %v1918_v43  ;;  %v1965_v48 = vsub.f32 %v3793_v2, %v1961_v34  ;;  %v1977_v18 = vmul.f32 %v2591_v60, %v3793_v2 }
 0x3ee   : > { %2563 = vpow2.f32 %v2027_v39  ;;  %v2079_v10 = vmul.f32 1.442695, %v2076_v55  ;;  %v1966_v54 = vsub.f32 %v3801_v17, %v1962_v45  ;;  %v1951_v24 = vmul.f32 %v1947_v25, %v3793_v2 }
 0x3ef   : > { %2565 = vrcp.f32 %v1929_v36  ;;  %v1967_v35 = vmul.f32 %v1965_v48, %v1905_v7  ;;  %v1952_v7 = vmul.f32 %v1948_v56, %v3801_v17  ;;  %v1978_v16 = vmul.f32 %v2592_v30, %v3801_v17 }
 0x3f0   : > { %2567 = vrcp.f32 %v1930_v57  ;;  %v1968_v58 = vmul.f32 %v1966_v54, %v1906_v47  ;;  %v1981_v57 = vrot.slane %v1977_v18, 7  ;;  %v2787_v23 = vmov 1966171168  }
 0x3f1   : > { %2569 = vpow2.f32 %v2029_v44  ;;  %v1971_v39 = vrot.slane %v1967_v35, 6  ;;  %v2097_v51 = vunpack.c.l.s4 %v2787_v23  ;;  %v1955_v55 = vrot.slane %v1951_v24, 6 }
 0x3f2   : > { %2571 = vpow2.f32 %v2005_v63  ;;  %v1972_v62 = vrot.slane %v1968_v58, 6  ;;  %v2069_v63 = vrot.slane %v3798_v41, 6  ;;  %v2070_v43 = vrot.slane %v3818_v20, 6 }
 0x3f3   : > { %2573 = vpow2.f32 %v2079_v10  ;;  %v1982_v10 = vrot.slane %v1978_v16, 7 }
 0x3f6   : > { %v2560_v42 = vpop.eup %2559 }
 0x3f7   : > { %v2007_v14 = vadd.f32 1.0, %v2560_v42 }
 0x3fa   : > { %v2562_v59 = vpop.eup %2561 }
 0x3fb   : > { %v2081_v22 = vadd.f32 1.0, %v2562_v59  ;;  %v2564_v15 = vpop.eup %2563 }
 0x3fc   : > { %v2031_v27 = vadd.f32 1.0, %v2564_v15  ;;  %v2566_v49 = vpop.eup %2565 }
 0x3fd   : > { %2575 = vlog2.f32 %v2081_v22  ;;  %v2568_v29 = vpop.eup %2567  ;;  %v1934_v46 = vmul.f32 %v2566_v49, %v1919_v28 }
 0x3fe   : > { %2577 = vrcp.f32 %v2007_v14  ;;  %v2570_v1 = vpop.eup %2569  ;;  %v1936_v13 = vmul.f32 %v2568_v29, %v1920_v26 }
 0x3ff   : > { %2579 = vrcp.f32 %v3798_v41  ;;  %v2572_v3 = vpop.eup %2571  ;;  %v2032_v50 = vadd.f32 1.0, %v2570_v1  ;;  %v1939_v12 = vrot.slane %v1934_v46, 3  ;;  %v2098_v1 = vunpack.c.0.s8 %v2097_v51 }
 0x400   : > { %2581 = vrcp.f32 %v2031_v27  ;;  %v2574_v9 = vpop.eup %2573  ;;  %v2008_v5 = vadd.f32 1.0, %v2572_v3  ;;  %v1940_v4 = vrot.slane %v1936_v13, 3 }
 0x401   : > { %2583 = vrcp.f32 %v3818_v20  ;;  %v2082_v32 = vadd.f32 1.0, %v2574_v9  ;;  %v1943_v38 = vadd.f32 %v1939_v12, %v3793_v2  ;;  %v1956_v2 = vrot.slane %v1952_v7, 6  ;;  %v3980_v20 = vld [vmem:[#allocation16_spill] sm:$0xff] }
 0x402   : > { %2585 = vrcp.f32 %v2032_v50  ;;  %v1944_v21 = vadd.f32 %v1940_v4, %v3801_v17  ;;  %v2101_v48 = vsub.s32 %v2098_v1, %v3980_v20  ;;  %v3981_v4 = vlaneseq }
 0x403   : > { %2587 = vrcp.f32 %v2008_v5  ;;  %v1975_v6 = vadd.f32 %v1971_v39, %v1943_v38  ;;  %v1959_v27 = vadd.f32 %v1955_v55, %v1943_v38 }
 0x404   : > { %2589 = vlog2.f32 %v2082_v32  ;;  %v1976_v8 = vadd.f32 %v1972_v62, %v1944_v21  ;;  %v1960_v29 = vadd.f32 %v1956_v2, %v1944_v21  ;;  %vm2114_vm1 = vcmp.lt.s32.totalorder %v3981_v4, 256 }
 0x405   : > { %v1985_v19 = vadd.f32 %v1981_v57, %v1975_v6 }
 0x406   : > { %v1986_v53 = vadd.f32 %v1982_v10, %v1976_v8 }
 0x40a   : > { %v2576_v37 = vpop.eup %2575 }
 0x40b   : > { %v2578_v0 = vpop.eup %2577  ;;  %v2084_v40 = vmul.f32 0.6931472, %v2576_v37 }
 0x40c   : > { %v2580_v36 = vpop.eup %2579  ;;  %v2047_v11 = vrot.slane %v2578_v0, 1 }
 0x40d   : > { %v2582_v47 = vpop.eup %2581  ;;  %v2087_v17 = vadd.f32 %v2084_v40, %v3812_v52  ;;  %v2073_v15 = vmul.f32 %v2580_v36, %v2069_v63 }
 0x40e   : > { %v2584_v31 = vpop.eup %2583  ;;  %v2039_v59 = vrot.slane %v2582_v47, 1  ;;  %v2051_v49 = vmul.f32 %v2047_v11, %v1985_v19 }
 0x40f   : > { %v2586_v44 = vpop.eup %2585  ;;  %v2074_v34 = vmul.f32 %v2584_v31, %v2070_v43  ;;  %v2089_v45 = vmul.f32 %v2087_v17, %v2073_v15 }
 0x410   : > { %v2588_v42 = vpop.eup %2587  ;;  %v2040_v33 = vrot.slane %v2586_v44, 1  ;;  %v2043_v26 = vmul.f32 %v2039_v59, %v1959_v27 }
 0x411   : > { %v2590_v22 = vpop.eup %2589  ;;  %v2048_v14 = vrot.slane %v2588_v42, 1 }
 0x412   : > { %v2086_v28 = vmul.f32 0.6931472, %v2590_v22  ;;  %v2044_v3 = vmul.f32 %v2040_v33, %v1960_v29  ;;  %v2053_v46 = vadd.f32 %v2051_v49, %v2043_v26 }
 0x413   : > { %v2052_v41 = vmul.f32 %v2048_v14, %v1986_v53 }
 0x414   : > { %v2088_v52 = vadd.f32 %v2086_v28, %v3830_v61  ;;  %v2091_v13 = vsub.f32 %v2053_v46, %v2089_v45 }
 0x415   : > { %v2054_v50 = vadd.f32 %v2052_v41, %v2044_v3 }
 0x416   : > { %v2090_v9 = vmul.f32 %v2088_v52, %v2074_v34 }
 0x418   : > { %v2092_v5 = vsub.f32 %v2054_v50, %v2090_v9 }
 0x41a   : > { %v2095_v32 = vcombine.low %v2091_v13, %v2092_v5 }
 0x41c   : > { %v2102_v54 = vrot.slane %v2095_v32, %v2101_v48 }
 0x41e   : > { %v2109_v12 = vrot.slane %v2102_v54, %v2101_v48  ;;  %2124 = sbr.rel (!%p2893_p6) target bundleno = 1086 (0x43e), region = 138 }
 0x420   : > { %v2110_v35 = vcombine.high %v2109_v12, %v2109_v12 }
 0x422   : > { %2116 = vst.msk [vmem:[%s858_s5] sm:$0x3] %vm2114_vm1, %v2110_v35 }
 0x423   : > { %s4002_s19 = smov (!%p2127_p10, %s2126_s19), 2 }
 0x424   : > { %s3864_s20 = sshll.u32 %s4002_s19, 4 }
 0x425   : > { %s2131_s28 = ssub.s32 32, %s3864_s20 }
 0x426   : > { %2132 = vsyncadd %s2118_s23, %s2131_s28  ;;  %p2352_p11 = scmp.ne.s32.totalorder %s3864_s20, 0  ;;  %s2361_s12 = sshll.u32 %s2875_s25, 5 }
 0x427   : > { %s3983_s13 = sld [smem:[#allocation22_spill]]  ;;  %s2137_s16 = sshll.u32 %s858_s5, 4  ;;  %s2138_s16 = int_to_ptr.vmem [resolvable:$true] %s2137_s16 }
 0x428   : > { %s2593_s30 = scalar_lea.vmem %s2138_s16, %s3864_s20  ;;  %s2788_s0 = smov [#allocation3]  }
 0x429   : > { %p2594_p6 = scmp.ne.s32.totalorder %s2138_s16, %s2593_s30  ;;  %s2597_s17 = sshll.u32 %s2788_s0, 4  ;;  %s2598_s17 = int_to_ptr.vmem [resolvable:$false] %s2597_s17 }
 0x42a   : > { %s2599_s26 = scalar_lea.vmem %s2598_s17, 64  ;;  %p2600_p0 = scmp.lt.s32.totalorder %s2138_s16, %s2598_s17 }
 0x42b   : > { %p2595_p12 = pnand %p2594_p6, %p2352_p11  ;;  %p2601_p1 = scmp.lt.s32.totalorder %s2599_s26, %s2593_s30 }
 0x42d   : > { %s2135_s7 = scalar_lea.hbm %s3983_s13, %s2361_s12  ;;  %p2596_p13 = pneg %p2595_p12 }
 0x42e   : > { %p2602_p2 = por %p2601_p1, %p2600_p0 }
 0x430   : > { %p2603_p3 = pnand %p2602_p2, %p2596_p13 }
 0x432   : > { %2606 = shalt.err (!%p2603_p3)
}
 0x433   : > { %s2607_s25 = scalar_lea.hbm %s2135_s7, %s3864_s20  ;;  %s2611_s19 = scalar_lea.hbm %s3983_s13, 48 }
 0x434   : > { %p2608_p4 = scmp.ne.s32.totalorder %s2135_s7, %s2607_s25  ;;  %p2612_p10 = scmp.lt.s32.totalorder %s2135_s7, %s3983_s13 }
 0x435   : > { %p2613_p6 = scmp.lt.s32.totalorder %s2611_s19, %s2607_s25 }
 0x436   : > { %p2609_p5 = pnand %p2608_p4, %p2352_p11 }
 0x437   : > { %p2614_p12 = por %p2613_p6, %p2612_p10 }
 0x438   : > { %p2610_p7 = pneg %p2609_p5 }
 0x43a   : > { %p2615_p0 = pnand %p2614_p12, %p2610_p7 }
 0x43c   : > { %2618 = shalt.err (!%p2615_p0)
}
 0x43d   : > { %2140 = dma.vmem_to_hbm [thread:$0]  (%p2352_p11), %s2138_s16, %s3864_s20, %s2135_s7, %s2118_s23  }
 0x43e PF: > { %s3984_s29 = sld [smem:[#allocation6_spill]]  ;;  %p2364_p13 = pnand %p2298_p9, %p2897_p8 }
 0x440   : > { %p2365_p1 = pneg %p2364_p13 }
 0x444   : > { %s2149_s30 = sand.u32 1, %s3984_s29  }
 0x445   : > { %s2150_s0 = scalar_lea.sflag [#allocation4], %s2149_s30 }
 0x446   : > { %2700 = dma.done.wait (%p2365_p1), %s2150_s0, 32  }
 0x447   : > { %2702 = vsyncadd (%p2365_p1), %s2150_s0, 4294967264  ;;  %s3986_s24 = sld [smem:[#allocation8_spill]]  ;;  %s3989_s21 = smov %s2709_s22 }
 0x448   : > { %s3987_s17 = sld [smem:[#allocation7_spill]] }
 0x449   : > { %s3988_s23 = sld [smem:[#allocation9_spill]] }
 0x44d   : > { %p22_p2 = scmp.ge.s32.totalorder %s3986_s24, 4  }
 0x44e   : > { %s3990_s22 = smov %s3987_s17 }
 0x44f   :  { %24 = sbr.rel (!%p22_p2) target bundleno = 8 (0x8), region = 239 }
 0x454   :  { %2155 = vsyncpa [#allocation4], 1 }
 0x455   :  { %2157 = vsyncpa [#allocation4 + $0x1], 1 }

</bundles_post_ra>
